<compile_context>
chip_gen: v7x
topology: tpu7x:2x2x1
jax: 0.10.0
libtpu: 0.0.40
codegen_flags: <defaults>
</compile_context>

<pallas_src>
import functools

import jax
import jax.numpy as jnp
from jax import lax
from jax.experimental import pallas as pl
from jax.experimental.pallas import tpu as pltpu


# ----------------------------------------------------------------------------
# Helpers
# ----------------------------------------------------------------------------
def _conv_out(size, k, s):
    return (size - k) // s + 1


def calculate_fc_input_dims(input_dims):
    _, h, w = input_dims
    h1, w1 = _conv_out(h, 8, 4), _conv_out(w, 8, 4)
    h2, w2 = _conv_out(h1, 4, 2), _conv_out(w1, 4, 2)
    h3, w3 = _conv_out(h2, 3, 1), _conv_out(w2, 3, 1)
    return 64 * h3 * w3


# ----------------------------------------------------------------------------
# Fused forward kernel (built per static config)
# ----------------------------------------------------------------------------
def _make_dqn_kernel(batch, oh1, ow1, oh2, ow2, oh3, ow3, c1, c2):
    """Emit the fused forward kernel body for the given static dims.

    All gathers are contiguous 2-D slices into VMEM scratch; each conv layer is
    a single wide-contraction GEMM with bf16 operands / f32 accumulation.
    """
    kh2 = kw2 = 4      # conv2 kernel
    s2 = 2             # conv2 stride
    kh3 = kw3 = 3      # conv3 kernel (stride 1)
    n = batch

    def kernel(p1_ref, w1_ref, b1_ref, w2_ref, b2_ref, w3_ref, b3_ref,
               w4_ref, b4_ref, w5_ref, b5_ref, o_ref,
               act1_ref, p2_ref, act2_ref, p3_ref):
        f32 = jnp.float32
        bf16 = jnp.bfloat16

        # ---- conv1: ONE GEMM on wrapper-built im2col patches (contraction 256).
        # p1 rows are ordered (x1, n, y1) so the scatter below is OW1 contiguous
        # (N*OH1, C1) block copies into the (rows=(n,y), lanes=(x,c)) layout.
        a1 = jnp.dot(p1_ref[...], w1_ref[...], preferred_element_type=f32)
        a1 = jnp.maximum(a1 + b1_ref[...], 0.0)
        rows1 = n * oh1
        for x1 in range(ow1):
            act1_ref[:, c1 * x1:c1 * (x1 + 1)] = a1[rows1 * x1:rows1 * (x1 + 1), :]

        # ---- conv2: assemble the (N*OH2*OW2, KH*KW*C1) patch matrix with
        # contiguous (1, KW*C1) row copies, then ONE GEMM (contraction 512).
        # Patch rows are ordered (ox, n, oy) so the output scatter is OW2
        # contiguous block copies.
        for ox in range(ow2):
            for b in range(n):
                for oy in range(oh2):
                    dst = (ox * n + b) * oh2 + oy
                    for i in range(kh2):
                        src = b * oh1 + s2 * oy + i
                        p2_ref[dst:dst + 1, (kw2 * c1) * i:(kw2 * c1) * (i + 1)] = \
                            act1_ref[src:src + 1, c1 * s2 * ox:c1 * (s2 * ox + kw2)]
        a2 = jnp.dot(p2_ref[...].astype(bf16), w2_ref[...],
                     preferred_element_type=f32)
        a2 = jnp.maximum(a2 + b2_ref[...], 0.0)
        rows2 = n * oh2
        for ox in range(ow2):
            act2_ref[:, c2 * ox:c2 * (ox + 1)] = a2[rows2 * ox:rows2 * (ox + 1), :]

        # ---- conv3 (3x3/1 on a 3x3 map -> 1x1): each patch row is KH3
        # contiguous full-row copies, then ONE GEMM (contraction 576).
        for b in range(n):
            for i in range(kh3):
                p3_ref[b:b + 1, (kw3 * c2) * i:(kw3 * c2) * (i + 1)] = \
                    act2_ref[b * oh2 + i:b * oh2 + i + 1, :]
        a3 = jnp.dot(p3_ref[...].astype(bf16), w3_ref[...],
                     preferred_element_type=f32)
        a3 = jnp.maximum(a3 + b3_ref[...], 0.0)

        # ---- Flatten + Linear(fc_in, 512) + ReLU.
        # OH3*OW3 == 1, so the torch channel-major flatten IS a3's channel
        # layout: no gather/transpose at all (review: special-case sp3 == 1).
        h = jnp.dot(a3.astype(bf16), w4_ref[...], preferred_element_type=f32)
        h = jnp.maximum(h + b4_ref[...], 0.0)

        # ---- Linear(512, n_actions), padded to a lane-dense 128-wide store.
        out = jnp.dot(h.astype(bf16), w5_ref[...], preferred_element_type=f32)
        o_ref[...] = (out + b5_ref[...]).astype(o_ref.dtype)

    scratch_shapes = [
        pltpu.VMEM((n * oh1, ow1 * c1), jnp.float32),               # act1
        pltpu.VMEM((n * oh2 * ow2, kh2 * kw2 * c1), jnp.float32),   # conv2 patches
        pltpu.VMEM((n * oh2, ow2 * c2), jnp.float32),               # act2
        pltpu.VMEM((n * oh3 * ow3, kh3 * kw3 * c2), jnp.float32),   # conv3 patches
    ]
    return kernel, scratch_shapes


# ----------------------------------------------------------------------------
# One-time parameter repacking (torch layouts -> kernel layouts, bf16 weights)
# ----------------------------------------------------------------------------
def prepare_kernel_params(params, input_dims, n_actions, lane_pad=128):
    _, h, w = input_dims
    oh1, ow1 = _conv_out(h, 8, 4), _conv_out(w, 8, 4)
    oh2, ow2 = _conv_out(oh1, 4, 2), _conv_out(ow1, 4, 2)
    oh3, ow3 = _conv_out(oh2, 3, 1), _conv_out(ow2, 3, 1)
    sp3 = oh3 * ow3
    bf16, f32 = jnp.bfloat16, jnp.float32

    def conv_w_rows(wt):  # OIHW -> (KH*KW*Cin, Cout), rows ordered (ky, kx, cin)
        return jnp.transpose(wt, (2, 3, 1, 0)).reshape(-1, wt.shape[0])

    # conv_general_dilated_patches orders features (cin, ky, kx) -> plain OIHW
    # row-major reshape of w1 matches directly.
    w1r = params["w1"].reshape(params["w1"].shape[0], -1).T.astype(bf16)
    w2r = conv_w_rows(params["w2"]).astype(bf16)
    w3r = conv_w_rows(params["w3"]).astype(bf16)
    # torch Flatten is channel-major over (C, H3, W3); regroup rows to
    # (y, x, c) to match the kernel's (rows=(n,y), lanes=(x,c)) activation.
    # (Identity when sp3 == 1.)
    w4r = (params["w4"].reshape(64, oh3, ow3, 512)
           .transpose(1, 2, 0, 3).reshape(64 * sp3, 512).astype(bf16))
    # Pad fc2 to a 128-wide action dim for a lane-dense output store.
    n_pad = ((n_actions + lane_pad - 1) // lane_pad) * lane_pad
    w5p = jnp.zeros((512, n_pad), f32).at[:, :n_actions].set(params["w5"]).astype(bf16)
    b5p = jnp.zeros((1, n_pad), f32).at[:, :n_actions].set(params["b5"][None, :])
    return {
        "w1r": w1r, "b1": params["b1"].reshape(1, -1).astype(f32),
        "w2r": w2r, "b2": params["b2"].reshape(1, -1).astype(f32),
        "w3r": w3r, "b3": params["b3"].reshape(1, -1).astype(f32),
        "w4r": w4r, "b4": params["b4"].reshape(1, -1).astype(f32),
        "w5p": w5p, "b5p": b5p,
    }


# ----------------------------------------------------------------------------
# Forward pass (matches ConvDeepQNetwork.forward)
# ----------------------------------------------------------------------------
def conv_dqn_forward(x_nchw, kp, *, n_actions):
    batch, _, h, w = x_nchw.shape
    oh1, ow1 = _conv_out(h, 8, 4), _conv_out(w, 8, 4)
    oh2, ow2 = _conv_out(oh1, 4, 2), _conv_out(ow1, 4, 2)
    oh3, ow3 = _conv_out(oh2, 3, 1), _conv_out(ow2, 3, 1)
    assert oh3 == 1 and ow3 == 1, "kernel specialised to configs with 1x1 conv3 output"
    # TODO(synk): for oh3*ow3 > 1 add an act3 scatter + one more patch assembly
    #   (same machinery) and keep the w4 row regrouping in prepare_kernel_params.

    c1, c2 = kp["w1r"].shape[1], kp["w2r"].shape[1]
    c3, fc_in, fc_h = kp["w3r"].shape[1], kp["w4r"].shape[0], kp["w4r"].shape[1]
    n_out_pad = kp["w5p"].shape[1]

    # conv1 im2col as ONE fused XLA op; rows reordered to (x1, n, y1) so the
    # in-kernel scatter into the (rows=(n,y), lanes=(x,c)) layout is OW1
    # contiguous block copies.  Cast to bf16 for the MXU.
    # TODO(synk): move this patch extraction in-kernel (pl.ds loads from the raw
    #   NCHW input) to drop the extra device op at inference batch sizes.
    p1 = lax.conv_general_dilated_patches(
        x_nchw.astype(jnp.float32), filter_shape=(8, 8), window_strides=(4, 4),
        padding="VALID", dimension_numbers=("NCHW", "OIHW", "NHWC"),
        precision=jax.lax.Precision.HIGHEST)
    p1 = jnp.transpose(p1, (2, 0, 1, 3)).reshape(ow1 * batch * oh1, -1)
    p1 = p1.astype(jnp.bfloat16)

    kernel, scratch_shapes = _make_dqn_kernel(
        batch, oh1, ow1, oh2, ow2, oh3, ow3, c1, c2)

    flops = 2 * (p1.shape[0] * p1.shape[1] * c1
                 + (batch * oh2 * ow2) * (16 * c1) * c2
                 + batch * (9 * c2) * c3
                 + batch * fc_in * fc_h
                 + batch * fc_h * n_out_pad)
    operands = (p1, kp["w1r"], kp["b1"], kp["w2r"], kp["b2"], kp["w3r"], kp["b3"],
                kp["w4r"], kp["b4"], kp["w5p"], kp["b5p"])
    bytes_accessed = (sum(int(a.size) * a.dtype.itemsize for a in operands)
                      + batch * n_out_pad * 4)

    out_pad = pl.pallas_call(
        kernel,
        out_shape=jax.ShapeDtypeStruct((batch, n_out_pad), jnp.float32),
        # Single grid step; every operand is a whole-array VMEM-resident block.
        in_specs=[pl.BlockSpec(memory_space=pltpu.MemorySpace.VMEM)] * len(operands),
        out_specs=pl.BlockSpec(memory_space=pltpu.MemorySpace.VMEM),
        scratch_shapes=scratch_shapes,
        compiler_params=pltpu.CompilerParams(vmem_limit_bytes=32 * 1024 * 1024),
        cost_estimate=pl.CostEstimate(flops=int(flops), transcendentals=0,
                                      bytes_accessed=int(bytes_accessed)),
    )(*operands)
    return out_pad[:, :n_actions]


# ----------------------------------------------------------------------------
# Pure-JAX reference (PyTorch-equivalent semantics) + param init
# ----------------------------------------------------------------------------
def conv_dqn_forward_ref(x_nchw, params):
    def conv(x, wt, b, s):
        y = lax.conv_general_dilated(
            x, wt, (s, s), "VALID", dimension_numbers=("NCHW", "OIHW", "NCHW"),
            precision=jax.lax.Precision.HIGHEST)
        return jax.nn.relu(y + b[None, :, None, None])

    y = conv(x_nchw, params["w1"], params["b1"], 4)
    y = conv(y, params["w2"], params["b2"], 2)
    y = conv(y, params["w3"], params["b3"], 1)
    y = y.reshape(y.shape[0], -1)                      # torch Flatten on NCHW
    y = jax.nn.relu(jnp.dot(y, params["w4"], precision=jax.lax.Precision.HIGHEST)
                    + params["b4"])
    return jnp.dot(y, params["w5"], precision=jax.lax.Precision.HIGHEST) + params["b5"]


def init_params(key, in_channels, n_actions, fc_input_dims):
    ks = jax.random.split(key, 10)
    s = 0.05
    return {
        "w1": s * jax.random.normal(ks[0], (32, in_channels, 8, 8), jnp.float32),
        "b1": s * jax.random.normal(ks[1], (32,), jnp.float32),
        "w2": s * jax.random.normal(ks[2], (64, 32, 4, 4), jnp.float32),
        "b2": s * jax.random.normal(ks[3], (64,), jnp.float32),
        "w3": s * jax.random.normal(ks[4], (64, 64, 3, 3), jnp.float32),
        "b3": s * jax.random.normal(ks[5], (64,), jnp.float32),
        # Linear weights stored as (in_features, out_features).
        "w4": s * jax.random.normal(ks[6], (fc_input_dims, 512), jnp.float32),
        "b4": s * jax.random.normal(ks[7], (512,), jnp.float32),
        "w5": s * jax.random.normal(ks[8], (512, n_actions), jnp.float32),
        "b5": s * jax.random.normal(ks[9], (n_actions,), jnp.float32),
    }


if __name__ == "__main__":
    # 36x36 input -> conv 8/4 -> 8x8 -> conv 4/2 -> 3x3 -> conv 3/1 -> 1x1 (x64 ch).
    batch, in_channels, H, W = 2, 4, 36, 36
    n_actions = 6
    input_dims = (in_channels, H, W)
    fc_input_dims = calculate_fc_input_dims(input_dims)   # = 64

    key = jax.random.PRNGKey(0)
    k_x, k_p = jax.random.split(key)
    x = jax.random.normal(k_x, (batch, in_channels, H, W), jnp.float32)
    params = init_params(k_p, in_channels, n_actions, fc_input_dims)
    kparams = prepare_kernel_params(params, input_dims, n_actions)

    fwd = jax.jit(functools.partial(conv_dqn_forward, n_actions=n_actions))
    actions = jax.block_until_ready(fwd(x, kparams))
    assert actions.shape == (batch, n_actions), actions.shape

    ref = conv_dqn_forward_ref(x, params)
    max_err = float(jnp.max(jnp.abs(actions - ref)))
    # bf16 MXU inputs with f32 accumulation -> tolerance loosened vs f32 reference.
    assert jnp.allclose(actions, ref, atol=2e-2, rtol=2e-2), max_err

    # TODO(synk): RMSprop optimizer, MSELoss and checkpoint save/load are
    # training/IO utilities, not part of the forward pass; not translated.
    print("KERNEL_OK")
</pallas_src>

<mosaic_0001>
module attributes {stable_mosaic.version = 11 : i64} {
  func.func @kernel(%arg0: memref<128x256xbf16, #tpu.memory_space<vmem>>, %arg1: memref<256x32xbf16, #tpu.memory_space<vmem>>, %arg2: memref<1x32xf32, #tpu.memory_space<vmem>>, %arg3: memref<512x64xbf16, #tpu.memory_space<vmem>>, %arg4: memref<1x64xf32, #tpu.memory_space<vmem>>, %arg5: memref<576x64xbf16, #tpu.memory_space<vmem>>, %arg6: memref<1x64xf32, #tpu.memory_space<vmem>>, %arg7: memref<64x512xbf16, #tpu.memory_space<vmem>>, %arg8: memref<1x512xf32, #tpu.memory_space<vmem>>, %arg9: memref<512x128xbf16, #tpu.memory_space<vmem>>, %arg10: memref<1x128xf32, #tpu.memory_space<vmem>>, %arg11: memref<2x128xf32, #tpu.memory_space<vmem>>, %arg12: memref<16x256xf32, #tpu.memory_space<vmem>>, %arg13: memref<18x512xf32, #tpu.memory_space<vmem>>, %arg14: memref<6x192xf32, #tpu.memory_space<vmem>>, %arg15: memref<2x576xf32, #tpu.memory_space<vmem>>) attributes {dimension_semantics = [], scalar_prefetch = 0 : i64, scratch_operands = 4 : i64, tpu.core_type = #tpu.core_type<tc>} {
    %c0 = arith.constant 0 : index
    %c0_0 = arith.constant 0 : index
    %0 = vector.load %arg0[%c0, %c0_0] : memref<128x256xbf16, #tpu.memory_space<vmem>>, vector<128x256xbf16>
    %c0_1 = arith.constant 0 : index
    %c0_2 = arith.constant 0 : index
    %1 = vector.load %arg1[%c0_1, %c0_2] : memref<256x32xbf16, #tpu.memory_space<vmem>>, vector<256x32xbf16>
    %cst = arith.constant dense<0.000000e+00> : vector<128x32xf32>
    %2 = tpu.matmul %0, %1, %cst {dimension_numbers = #tpu.dot_dimension_numbers<[1], [0], [0], [1], [0, 0, 1, 1], [], []>} : vector<128x256xbf16>, vector<256x32xbf16>, vector<128x32xf32> -> vector<128x32xf32>
    %c0_3 = arith.constant 0 : index
    %c0_4 = arith.constant 0 : index
    %3 = vector.load %arg2[%c0_3, %c0_4] : memref<1x32xf32, #tpu.memory_space<vmem>>, vector<1x32xf32>
    %4 = vector.broadcast %3 : vector<1x32xf32> to vector<128x32xf32>
    %5 = arith.addf %2, %4 : vector<128x32xf32>
    %cst_5 = arith.constant 0.000000e+00 : f32
    %6 = vector.broadcast %cst_5 : f32 to vector<128x32xf32>
    %7 = arith.maximumf %5, %6 : vector<128x32xf32>
    %8 = vector.extract_strided_slice %7 {offsets = [0, 0], sizes = [16, 32], strides = [1, 1]} : vector<128x32xf32> to vector<16x32xf32>
    %c0_6 = arith.constant 0 : index
    %c0_7 = arith.constant 0 : index
    %9 = vector.load %arg12[%c0_6, %c0_7] : memref<16x256xf32, #tpu.memory_space<vmem>>, vector<16x32xf32>
    tpu.vector_store %arg12[%c0_6, %c0_7], %8 {strides = array<i32>} : memref<16x256xf32, #tpu.memory_space<vmem>>, vector<16x32xf32>,
    %10 = vector.extract_strided_slice %7 {offsets = [16, 0], sizes = [16, 32], strides = [1, 1]} : vector<128x32xf32> to vector<16x32xf32>
    %c0_8 = arith.constant 0 : index
    %c32 = arith.constant 32 : index
    %11 = vector.load %arg12[%c0_8, %c32] : memref<16x256xf32, #tpu.memory_space<vmem>>, vector<16x32xf32>
    tpu.vector_store %arg12[%c0_8, %c32], %10 {strides = array<i32>} : memref<16x256xf32, #tpu.memory_space<vmem>>, vector<16x32xf32>,
    %12 = vector.extract_strided_slice %7 {offsets = [32, 0], sizes = [16, 32], strides = [1, 1]} : vector<128x32xf32> to vector<16x32xf32>
    %c0_9 = arith.constant 0 : index
    %c64 = arith.constant 64 : index
    %13 = vector.load %arg12[%c0_9, %c64] : memref<16x256xf32, #tpu.memory_space<vmem>>, vector<16x32xf32>
    tpu.vector_store %arg12[%c0_9, %c64], %12 {strides = array<i32>} : memref<16x256xf32, #tpu.memory_space<vmem>>, vector<16x32xf32>,
    %14 = vector.extract_strided_slice %7 {offsets = [48, 0], sizes = [16, 32], strides = [1, 1]} : vector<128x32xf32> to vector<16x32xf32>
    %c0_10 = arith.constant 0 : index
    %c96 = arith.constant 96 : index
    %15 = vector.load %arg12[%c0_10, %c96] : memref<16x256xf32, #tpu.memory_space<vmem>>, vector<16x32xf32>
    tpu.vector_store %arg12[%c0_10, %c96], %14 {strides = array<i32>} : memref<16x256xf32, #tpu.memory_space<vmem>>, vector<16x32xf32>,
    %16 = vector.extract_strided_slice %7 {offsets = [64, 0], sizes = [16, 32], strides = [1, 1]} : vector<128x32xf32> to vector<16x32xf32>
    %c0_11 = arith.constant 0 : index
    %c128 = arith.constant 128 : index
    %17 = vector.load %arg12[%c0_11, %c128] : memref<16x256xf32, #tpu.memory_space<vmem>>, vector<16x32xf32>
    tpu.vector_store %arg12[%c0_11, %c128], %16 {strides = array<i32>} : memref<16x256xf32, #tpu.memory_space<vmem>>, vector<16x32xf32>,
    %18 = vector.extract_strided_slice %7 {offsets = [80, 0], sizes = [16, 32], strides = [1, 1]} : vector<128x32xf32> to vector<16x32xf32>
    %c0_12 = arith.constant 0 : index
    %c160 = arith.constant 160 : index
    %19 = vector.load %arg12[%c0_12, %c160] : memref<16x256xf32, #tpu.memory_space<vmem>>, vector<16x32xf32>
    tpu.vector_store %arg12[%c0_12, %c160], %18 {strides = array<i32>} : memref<16x256xf32, #tpu.memory_space<vmem>>, vector<16x32xf32>,
    %20 = vector.extract_strided_slice %7 {offsets = [96, 0], sizes = [16, 32], strides = [1, 1]} : vector<128x32xf32> to vector<16x32xf32>
    %c0_13 = arith.constant 0 : index
    %c192 = arith.constant 192 : index
    %21 = vector.load %arg12[%c0_13, %c192] : memref<16x256xf32, #tpu.memory_space<vmem>>, vector<16x32xf32>
    tpu.vector_store %arg12[%c0_13, %c192], %20 {strides = array<i32>} : memref<16x256xf32, #tpu.memory_space<vmem>>, vector<16x32xf32>,
    %22 = vector.extract_strided_slice %7 {offsets = [112, 0], sizes = [16, 32], strides = [1, 1]} : vector<128x32xf32> to vector<16x32xf32>
    %c0_14 = arith.constant 0 : index
    %c224 = arith.constant 224 : index
    %23 = vector.load %arg12[%c0_14, %c224] : memref<16x256xf32, #tpu.memory_space<vmem>>, vector<16x32xf32>
    tpu.vector_store %arg12[%c0_14, %c224], %22 {strides = array<i32>} : memref<16x256xf32, #tpu.memory_space<vmem>>, vector<16x32xf32>,
    %c0_15 = arith.constant 0 : index
    %c0_16 = arith.constant 0 : index
    %24 = vector.load %arg12[%c0_15, %c0_16] : memref<16x256xf32, #tpu.memory_space<vmem>>, vector<1x128xf32>
    %c0_17 = arith.constant 0 : index
    %c0_18 = arith.constant 0 : index
    %25 = vector.load %arg13[%c0_17, %c0_18] : memref<18x512xf32, #tpu.memory_space<vmem>>, vector<1x128xf32>
    tpu.vector_store %arg13[%c0_17, %c0_18], %24 {strides = array<i32>} : memref<18x512xf32, #tpu.memory_space<vmem>>, vector<1x128xf32>,
    %c1 = arith.constant 1 : index
    %c0_19 = arith.constant 0 : index
    %26 = vector.load %arg12[%c1, %c0_19] : memref<16x256xf32, #tpu.memory_space<vmem>>, vector<1x128xf32>
    %c0_20 = arith.constant 0 : index
    %c128_21 = arith.constant 128 : index
    %27 = vector.load %arg13[%c0_20, %c128_21] : memref<18x512xf32, #tpu.memory_space<vmem>>, vector<1x128xf32>
    tpu.vector_store %arg13[%c0_20, %c128_21], %26 {strides = array<i32>} : memref<18x512xf32, #tpu.memory_space<vmem>>, vector<1x128xf32>,
    %c2 = arith.constant 2 : index
    %c0_22 = arith.constant 0 : index
    %28 = vector.load %arg12[%c2, %c0_22] : memref<16x256xf32, #tpu.memory_space<vmem>>, vector<1x128xf32>
    %c0_23 = arith.constant 0 : index
    %c256 = arith.constant 256 : index
    %29 = vector.load %arg13[%c0_23, %c256] : memref<18x512xf32, #tpu.memory_space<vmem>>, vector<1x128xf32>
    tpu.vector_store %arg13[%c0_23, %c256], %28 {strides = array<i32>} : memref<18x512xf32, #tpu.memory_space<vmem>>, vector<1x128xf32>,
    %c3 = arith.constant 3 : index
    %c0_24 = arith.constant 0 : index
    %30 = vector.load %arg12[%c3, %c0_24] : memref<16x256xf32, #tpu.memory_space<vmem>>, vector<1x128xf32>
    %c0_25 = arith.constant 0 : index
    %c384 = arith.constant 384 : index
    %31 = vector.load %arg13[%c0_25, %c384] : memref<18x512xf32, #tpu.memory_space<vmem>>, vector<1x128xf32>
    tpu.vector_store %arg13[%c0_25, %c384], %30 {strides = array<i32>} : memref<18x512xf32, #tpu.memory_space<vmem>>, vector<1x128xf32>,
    %c2_26 = arith.constant 2 : index
    %c0_27 = arith.constant 0 : index
    %32 = vector.load %arg12[%c2_26, %c0_27] : memref<16x256xf32, #tpu.memory_space<vmem>>, vector<1x128xf32>
    %c1_28 = arith.constant 1 : index
    %c0_29 = arith.constant 0 : index
    %33 = vector.load %arg13[%c1_28, %c0_29] : memref<18x512xf32, #tpu.memory_space<vmem>>, vector<1x128xf32>
    tpu.vector_store %arg13[%c1_28, %c0_29], %32 {strides = array<i32>} : memref<18x512xf32, #tpu.memory_space<vmem>>, vector<1x128xf32>,
    %c3_30 = arith.constant 3 : index
    %c0_31 = arith.constant 0 : index
    %34 = vector.load %arg12[%c3_30, %c0_31] : memref<16x256xf32, #tpu.memory_space<vmem>>, vector<1x128xf32>
    %c1_32 = arith.constant 1 : index
    %c128_33 = arith.constant 128 : index
    %35 = vector.load %arg13[%c1_32, %c128_33] : memref<18x512xf32, #tpu.memory_space<vmem>>, vector<1x128xf32>
    tpu.vector_store %arg13[%c1_32, %c128_33], %34 {strides = array<i32>} : memref<18x512xf32, #tpu.memory_space<vmem>>, vector<1x128xf32>,
    %c4 = arith.constant 4 : index
    %c0_34 = arith.constant 0 : index
    %36 = vector.load %arg12[%c4, %c0_34] : memref<16x256xf32, #tpu.memory_space<vmem>>, vector<1x128xf32>
    %c1_35 = arith.constant 1 : index
    %c256_36 = arith.constant 256 : index
    %37 = vector.load %arg13[%c1_35, %c256_36] : memref<18x512xf32, #tpu.memory_space<vmem>>, vector<1x128xf32>
    tpu.vector_store %arg13[%c1_35, %c256_36], %36 {strides = array<i32>} : memref<18x512xf32, #tpu.memory_space<vmem>>, vector<1x128xf32>,
    %c5 = arith.constant 5 : index
    %c0_37 = arith.constant 0 : index
    %38 = vector.load %arg12[%c5, %c0_37] : memref<16x256xf32, #tpu.memory_space<vmem>>, vector<1x128xf32>
    %c1_38 = arith.constant 1 : index
    %c384_39 = arith.constant 384 : index
    %39 = vector.load %arg13[%c1_38, %c384_39] : memref<18x512xf32, #tpu.memory_space<vmem>>, vector<1x128xf32>
    tpu.vector_store %arg13[%c1_38, %c384_39], %38 {strides = array<i32>} : memref<18x512xf32, #tpu.memory_space<vmem>>, vector<1x128xf32>,
    %c4_40 = arith.constant 4 : index
    %c0_41 = arith.constant 0 : index
    %40 = vector.load %arg12[%c4_40, %c0_41] : memref<16x256xf32, #tpu.memory_space<vmem>>, vector<1x128xf32>
    %c2_42 = arith.constant 2 : index
    %c0_43 = arith.constant 0 : index
    %41 = vector.load %arg13[%c2_42, %c0_43] : memref<18x512xf32, #tpu.memory_space<vmem>>, vector<1x128xf32>
    tpu.vector_store %arg13[%c2_42, %c0_43], %40 {strides = array<i32>} : memref<18x512xf32, #tpu.memory_space<vmem>>, vector<1x128xf32>,
    %c5_44 = arith.constant 5 : index
    %c0_45 = arith.constant 0 : index
    %42 = vector.load %arg12[%c5_44, %c0_45] : memref<16x256xf32, #tpu.memory_space<vmem>>, vector<1x128xf32>
    %c2_46 = arith.constant 2 : index
    %c128_47 = arith.constant 128 : index
    %43 = vector.load %arg13[%c2_46, %c128_47] : memref<18x512xf32, #tpu.memory_space<vmem>>, vector<1x128xf32>
    tpu.vector_store %arg13[%c2_46, %c128_47], %42 {strides = array<i32>} : memref<18x512xf32, #tpu.memory_space<vmem>>, vector<1x128xf32>,
    %c6 = arith.constant 6 : index
    %c0_48 = arith.constant 0 : index
    %44 = vector.load %arg12[%c6, %c0_48] : memref<16x256xf32, #tpu.memory_space<vmem>>, vector<1x128xf32>
    %c2_49 = arith.constant 2 : index
    %c256_50 = arith.constant 256 : index
    %45 = vector.load %arg13[%c2_49, %c256_50] : memref<18x512xf32, #tpu.memory_space<vmem>>, vector<1x128xf32>
    tpu.vector_store %arg13[%c2_49, %c256_50], %44 {strides = array<i32>} : memref<18x512xf32, #tpu.memory_space<vmem>>, vector<1x128xf32>,
    %c7 = arith.constant 7 : index
    %c0_51 = arith.constant 0 : index
    %46 = vector.load %arg12[%c7, %c0_51] : memref<16x256xf32, #tpu.memory_space<vmem>>, vector<1x128xf32>
    %c2_52 = arith.constant 2 : index
    %c384_53 = arith.constant 384 : index
    %47 = vector.load %arg13[%c2_52, %c384_53] : memref<18x512xf32, #tpu.memory_space<vmem>>, vector<1x128xf32>
    tpu.vector_store %arg13[%c2_52, %c384_53], %46 {strides = array<i32>} : memref<18x512xf32, #tpu.memory_space<vmem>>, vector<1x128xf32>,
    %c8 = arith.constant 8 : index
    %c0_54 = arith.constant 0 : index
    %48 = vector.load %arg12[%c8, %c0_54] : memref<16x256xf32, #tpu.memory_space<vmem>>, vector<1x128xf32>
    %c3_55 = arith.constant 3 : index
    %c0_56 = arith.constant 0 : index
    %49 = vector.load %arg13[%c3_55, %c0_56] : memref<18x512xf32, #tpu.memory_space<vmem>>, vector<1x128xf32>
    tpu.vector_store %arg13[%c3_55, %c0_56], %48 {strides = array<i32>} : memref<18x512xf32, #tpu.memory_space<vmem>>, vector<1x128xf32>,
    %c9 = arith.constant 9 : index
    %c0_57 = arith.constant 0 : index
    %50 = vector.load %arg12[%c9, %c0_57] : memref<16x256xf32, #tpu.memory_space<vmem>>, vector<1x128xf32>
    %c3_58 = arith.constant 3 : index
    %c128_59 = arith.constant 128 : index
    %51 = vector.load %arg13[%c3_58, %c128_59] : memref<18x512xf32, #tpu.memory_space<vmem>>, vector<1x128xf32>
    tpu.vector_store %arg13[%c3_58, %c128_59], %50 {strides = array<i32>} : memref<18x512xf32, #tpu.memory_space<vmem>>, vector<1x128xf32>,
    %c10 = arith.constant 10 : index
    %c0_60 = arith.constant 0 : index
    %52 = vector.load %arg12[%c10, %c0_60] : memref<16x256xf32, #tpu.memory_space<vmem>>, vector<1x128xf32>
    %c3_61 = arith.constant 3 : index
    %c256_62 = arith.constant 256 : index
    %53 = vector.load %arg13[%c3_61, %c256_62] : memref<18x512xf32, #tpu.memory_space<vmem>>, vector<1x128xf32>
    tpu.vector_store %arg13[%c3_61, %c256_62], %52 {strides = array<i32>} : memref<18x512xf32, #tpu.memory_space<vmem>>, vector<1x128xf32>,
    %c11 = arith.constant 11 : index
    %c0_63 = arith.constant 0 : index
    %54 = vector.load %arg12[%c11, %c0_63] : memref<16x256xf32, #tpu.memory_space<vmem>>, vector<1x128xf32>
    %c3_64 = arith.constant 3 : index
    %c384_65 = arith.constant 384 : index
    %55 = vector.load %arg13[%c3_64, %c384_65] : memref<18x512xf32, #tpu.memory_space<vmem>>, vector<1x128xf32>
    tpu.vector_store %arg13[%c3_64, %c384_65], %54 {strides = array<i32>} : memref<18x512xf32, #tpu.memory_space<vmem>>, vector<1x128xf32>,
    %c10_66 = arith.constant 10 : index
    %c0_67 = arith.constant 0 : index
    %56 = vector.load %arg12[%c10_66, %c0_67] : memref<16x256xf32, #tpu.memory_space<vmem>>, vector<1x128xf32>
    %c4_68 = arith.constant 4 : index
    %c0_69 = arith.constant 0 : index
    %57 = vector.load %arg13[%c4_68, %c0_69] : memref<18x512xf32, #tpu.memory_space<vmem>>, vector<1x128xf32>
    tpu.vector_store %arg13[%c4_68, %c0_69], %56 {strides = array<i32>} : memref<18x512xf32, #tpu.memory_space<vmem>>, vector<1x128xf32>,
    %c11_70 = arith.constant 11 : index
    %c0_71 = arith.constant 0 : index
    %58 = vector.load %arg12[%c11_70, %c0_71] : memref<16x256xf32, #tpu.memory_space<vmem>>, vector<1x128xf32>
    %c4_72 = arith.constant 4 : index
    %c128_73 = arith.constant 128 : index
    %59 = vector.load %arg13[%c4_72, %c128_73] : memref<18x512xf32, #tpu.memory_space<vmem>>, vector<1x128xf32>
    tpu.vector_store %arg13[%c4_72, %c128_73], %58 {strides = array<i32>} : memref<18x512xf32, #tpu.memory_space<vmem>>, vector<1x128xf32>,
    %c12 = arith.constant 12 : index
    %c0_74 = arith.constant 0 : index
    %60 = vector.load %arg12[%c12, %c0_74] : memref<16x256xf32, #tpu.memory_space<vmem>>, vector<1x128xf32>
    %c4_75 = arith.constant 4 : index
    %c256_76 = arith.constant 256 : index
    %61 = vector.load %arg13[%c4_75, %c256_76] : memref<18x512xf32, #tpu.memory_space<vmem>>, vector<1x128xf32>
    tpu.vector_store %arg13[%c4_75, %c256_76], %60 {strides = array<i32>} : memref<18x512xf32, #tpu.memory_space<vmem>>, vector<1x128xf32>,
    %c13 = arith.constant 13 : index
    %c0_77 = arith.constant 0 : index
    %62 = vector.load %arg12[%c13, %c0_77] : memref<16x256xf32, #tpu.memory_space<vmem>>, vector<1x128xf32>
    %c4_78 = arith.constant 4 : index
    %c384_79 = arith.constant 384 : index
    %63 = vector.load %arg13[%c4_78, %c384_79] : memref<18x512xf32, #tpu.memory_space<vmem>>, vector<1x128xf32>
    tpu.vector_store %arg13[%c4_78, %c384_79], %62 {strides = array<i32>} : memref<18x512xf32, #tpu.memory_space<vmem>>, vector<1x128xf32>,
    %c12_80 = arith.constant 12 : index
    %c0_81 = arith.constant 0 : index
    %64 = vector.load %arg12[%c12_80, %c0_81] : memref<16x256xf32, #tpu.memory_space<vmem>>, vector<1x128xf32>
    %c5_82 = arith.constant 5 : index
    %c0_83 = arith.constant 0 : index
    %65 = vector.load %arg13[%c5_82, %c0_83] : memref<18x512xf32, #tpu.memory_space<vmem>>, vector<1x128xf32>
    tpu.vector_store %arg13[%c5_82, %c0_83], %64 {strides = array<i32>} : memref<18x512xf32, #tpu.memory_space<vmem>>, vector<1x128xf32>,
    %c13_84 = arith.constant 13 : index
    %c0_85 = arith.constant 0 : index
    %66 = vector.load %arg12[%c13_84, %c0_85] : memref<16x256xf32, #tpu.memory_space<vmem>>, vector<1x128xf32>
    %c5_86 = arith.constant 5 : index
    %c128_87 = arith.constant 128 : index
    %67 = vector.load %arg13[%c5_86, %c128_87] : memref<18x512xf32, #tpu.memory_space<vmem>>, vector<1x128xf32>
    tpu.vector_store %arg13[%c5_86, %c128_87], %66 {strides = array<i32>} : memref<18x512xf32, #tpu.memory_space<vmem>>, vector<1x128xf32>,
    %c14 = arith.constant 14 : index
    %c0_88 = arith.constant 0 : index
    %68 = vector.load %arg12[%c14, %c0_88] : memref<16x256xf32, #tpu.memory_space<vmem>>, vector<1x128xf32>
    %c5_89 = arith.constant 5 : index
    %c256_90 = arith.constant 256 : index
    %69 = vector.load %arg13[%c5_89, %c256_90] : memref<18x512xf32, #tpu.memory_space<vmem>>, vector<1x128xf32>
    tpu.vector_store %arg13[%c5_89, %c256_90], %68 {strides = array<i32>} : memref<18x512xf32, #tpu.memory_space<vmem>>, vector<1x128xf32>,
    %c15 = arith.constant 15 : index
    %c0_91 = arith.constant 0 : index
    %70 = vector.load %arg12[%c15, %c0_91] : memref<16x256xf32, #tpu.memory_space<vmem>>, vector<1x128xf32>
    %c5_92 = arith.constant 5 : index
    %c384_93 = arith.constant 384 : index
    %71 = vector.load %arg13[%c5_92, %c384_93] : memref<18x512xf32, #tpu.memory_space<vmem>>, vector<1x128xf32>
    tpu.vector_store %arg13[%c5_92, %c384_93], %70 {strides = array<i32>} : memref<18x512xf32, #tpu.memory_space<vmem>>, vector<1x128xf32>,
    %c0_94 = arith.constant 0 : index
    %c64_95 = arith.constant 64 : index
    %72 = vector.load %arg12[%c0_94, %c64_95] : memref<16x256xf32, #tpu.memory_space<vmem>>, vector<1x128xf32>
    %c6_96 = arith.constant 6 : index
    %c0_97 = arith.constant 0 : index
    %73 = vector.load %arg13[%c6_96, %c0_97] : memref<18x512xf32, #tpu.memory_space<vmem>>, vector<1x128xf32>
    tpu.vector_store %arg13[%c6_96, %c0_97], %72 {strides = array<i32>} : memref<18x512xf32, #tpu.memory_space<vmem>>, vector<1x128xf32>,
    %c1_98 = arith.constant 1 : index
    %c64_99 = arith.constant 64 : index
    %74 = vector.load %arg12[%c1_98, %c64_99] : memref<16x256xf32, #tpu.memory_space<vmem>>, vector<1x128xf32>
    %c6_100 = arith.constant 6 : index
    %c128_101 = arith.constant 128 : index
    %75 = vector.load %arg13[%c6_100, %c128_101] : memref<18x512xf32, #tpu.memory_space<vmem>>, vector<1x128xf32>
    tpu.vector_store %arg13[%c6_100, %c128_101], %74 {strides = array<i32>} : memref<18x512xf32, #tpu.memory_space<vmem>>, vector<1x128xf32>,
    %c2_102 = arith.constant 2 : index
    %c64_103 = arith.constant 64 : index
    %76 = vector.load %arg12[%c2_102, %c64_103] : memref<16x256xf32, #tpu.memory_space<vmem>>, vector<1x128xf32>
    %c6_104 = arith.constant 6 : index
    %c256_105 = arith.constant 256 : index
    %77 = vector.load %arg13[%c6_104, %c256_105] : memref<18x512xf32, #tpu.memory_space<vmem>>, vector<1x128xf32>
    tpu.vector_store %arg13[%c6_104, %c256_105], %76 {strides = array<i32>} : memref<18x512xf32, #tpu.memory_space<vmem>>, vector<1x128xf32>,
    %c3_106 = arith.constant 3 : index
    %c64_107 = arith.constant 64 : index
    %78 = vector.load %arg12[%c3_106, %c64_107] : memref<16x256xf32, #tpu.memory_space<vmem>>, vector<1x128xf32>
    %c6_108 = arith.constant 6 : index
    %c384_109 = arith.constant 384 : index
    %79 = vector.load %arg13[%c6_108, %c384_109] : memref<18x512xf32, #tpu.memory_space<vmem>>, vector<1x128xf32>
    tpu.vector_store %arg13[%c6_108, %c384_109], %78 {strides = array<i32>} : memref<18x512xf32, #tpu.memory_space<vmem>>, vector<1x128xf32>,
    %c2_110 = arith.constant 2 : index
    %c64_111 = arith.constant 64 : index
    %80 = vector.load %arg12[%c2_110, %c64_111] : memref<16x256xf32, #tpu.memory_space<vmem>>, vector<1x128xf32>
    %c7_112 = arith.constant 7 : index
    %c0_113 = arith.constant 0 : index
    %81 = vector.load %arg13[%c7_112, %c0_113] : memref<18x512xf32, #tpu.memory_space<vmem>>, vector<1x128xf32>
    tpu.vector_store %arg13[%c7_112, %c0_113], %80 {strides = array<i32>} : memref<18x512xf32, #tpu.memory_space<vmem>>, vector<1x128xf32>,
    %c3_114 = arith.constant 3 : index
    %c64_115 = arith.constant 64 : index
    %82 = vector.load %arg12[%c3_114, %c64_115] : memref<16x256xf32, #tpu.memory_space<vmem>>, vector<1x128xf32>
    %c7_116 = arith.constant 7 : index
    %c128_117 = arith.constant 128 : index
    %83 = vector.load %arg13[%c7_116, %c128_117] : memref<18x512xf32, #tpu.memory_space<vmem>>, vector<1x128xf32>
    tpu.vector_store %arg13[%c7_116, %c128_117], %82 {strides = array<i32>} : memref<18x512xf32, #tpu.memory_space<vmem>>, vector<1x128xf32>,
    %c4_118 = arith.constant 4 : index
    %c64_119 = arith.constant 64 : index
    %84 = vector.load %arg12[%c4_118, %c64_119] : memref<16x256xf32, #tpu.memory_space<vmem>>, vector<1x128xf32>
    %c7_120 = arith.constant 7 : index
    %c256_121 = arith.constant 256 : index
    %85 = vector.load %arg13[%c7_120, %c256_121] : memref<18x512xf32, #tpu.memory_space<vmem>>, vector<1x128xf32>
    tpu.vector_store %arg13[%c7_120, %c256_121], %84 {strides = array<i32>} : memref<18x512xf32, #tpu.memory_space<vmem>>, vector<1x128xf32>,
    %c5_122 = arith.constant 5 : index
    %c64_123 = arith.constant 64 : index
    %86 = vector.load %arg12[%c5_122, %c64_123] : memref<16x256xf32, #tpu.memory_space<vmem>>, vector<1x128xf32>
    %c7_124 = arith.constant 7 : index
    %c384_125 = arith.constant 384 : index
    %87 = vector.load %arg13[%c7_124, %c384_125] : memref<18x512xf32, #tpu.memory_space<vmem>>, vector<1x128xf32>
    tpu.vector_store %arg13[%c7_124, %c384_125], %86 {strides = array<i32>} : memref<18x512xf32, #tpu.memory_space<vmem>>, vector<1x128xf32>,
    %c4_126 = arith.constant 4 : index
    %c64_127 = arith.constant 64 : index
    %88 = vector.load %arg12[%c4_126, %c64_127] : memref<16x256xf32, #tpu.memory_space<vmem>>, vector<1x128xf32>
    %c8_128 = arith.constant 8 : index
    %c0_129 = arith.constant 0 : index
    %89 = vector.load %arg13[%c8_128, %c0_129] : memref<18x512xf32, #tpu.memory_space<vmem>>, vector<1x128xf32>
    tpu.vector_store %arg13[%c8_128, %c0_129], %88 {strides = array<i32>} : memref<18x512xf32, #tpu.memory_space<vmem>>, vector<1x128xf32>,
    %c5_130 = arith.constant 5 : index
    %c64_131 = arith.constant 64 : index
    %90 = vector.load %arg12[%c5_130, %c64_131] : memref<16x256xf32, #tpu.memory_space<vmem>>, vector<1x128xf32>
    %c8_132 = arith.constant 8 : index
    %c128_133 = arith.constant 128 : index
    %91 = vector.load %arg13[%c8_132, %c128_133] : memref<18x512xf32, #tpu.memory_space<vmem>>, vector<1x128xf32>
    tpu.vector_store %arg13[%c8_132, %c128_133], %90 {strides = array<i32>} : memref<18x512xf32, #tpu.memory_space<vmem>>, vector<1x128xf32>,
    %c6_134 = arith.constant 6 : index
    %c64_135 = arith.constant 64 : index
    %92 = vector.load %arg12[%c6_134, %c64_135] : memref<16x256xf32, #tpu.memory_space<vmem>>, vector<1x128xf32>
    %c8_136 = arith.constant 8 : index
    %c256_137 = arith.constant 256 : index
    %93 = vector.load %arg13[%c8_136, %c256_137] : memref<18x512xf32, #tpu.memory_space<vmem>>, vector<1x128xf32>
    tpu.vector_store %arg13[%c8_136, %c256_137], %92 {strides = array<i32>} : memref<18x512xf32, #tpu.memory_space<vmem>>, vector<1x128xf32>,
    %c7_138 = arith.constant 7 : index
    %c64_139 = arith.constant 64 : index
    %94 = vector.load %arg12[%c7_138, %c64_139] : memref<16x256xf32, #tpu.memory_space<vmem>>, vector<1x128xf32>
    %c8_140 = arith.constant 8 : index
    %c384_141 = arith.constant 384 : index
    %95 = vector.load %arg13[%c8_140, %c384_141] : memref<18x512xf32, #tpu.memory_space<vmem>>, vector<1x128xf32>
    tpu.vector_store %arg13[%c8_140, %c384_141], %94 {strides = array<i32>} : memref<18x512xf32, #tpu.memory_space<vmem>>, vector<1x128xf32>,
    %c8_142 = arith.constant 8 : index
    %c64_143 = arith.constant 64 : index
    %96 = vector.load %arg12[%c8_142, %c64_143] : memref<16x256xf32, #tpu.memory_space<vmem>>, vector<1x128xf32>
    %c9_144 = arith.constant 9 : index
    %c0_145 = arith.constant 0 : index
    %97 = vector.load %arg13[%c9_144, %c0_145] : memref<18x512xf32, #tpu.memory_space<vmem>>, vector<1x128xf32>
    tpu.vector_store %arg13[%c9_144, %c0_145], %96 {strides = array<i32>} : memref<18x512xf32, #tpu.memory_space<vmem>>, vector<1x128xf32>,
    %c9_146 = arith.constant 9 : index
    %c64_147 = arith.constant 64 : index
    %98 = vector.load %arg12[%c9_146, %c64_147] : memref<16x256xf32, #tpu.memory_space<vmem>>, vector<1x128xf32>
    %c9_148 = arith.constant 9 : index
    %c128_149 = arith.constant 128 : index
    %99 = vector.load %arg13[%c9_148, %c128_149] : memref<18x512xf32, #tpu.memory_space<vmem>>, vector<1x128xf32>
    tpu.vector_store %arg13[%c9_148, %c128_149], %98 {strides = array<i32>} : memref<18x512xf32, #tpu.memory_space<vmem>>, vector<1x128xf32>,
    %c10_150 = arith.constant 10 : index
    %c64_151 = arith.constant 64 : index
    %100 = vector.load %arg12[%c10_150, %c64_151] : memref<16x256xf32, #tpu.memory_space<vmem>>, vector<1x128xf32>
    %c9_152 = arith.constant 9 : index
    %c256_153 = arith.constant 256 : index
    %101 = vector.load %arg13[%c9_152, %c256_153] : memref<18x512xf32, #tpu.memory_space<vmem>>, vector<1x128xf32>
    tpu.vector_store %arg13[%c9_152, %c256_153], %100 {strides = array<i32>} : memref<18x512xf32, #tpu.memory_space<vmem>>, vector<1x128xf32>,
    %c11_154 = arith.constant 11 : index
    %c64_155 = arith.constant 64 : index
    %102 = vector.load %arg12[%c11_154, %c64_155] : memref<16x256xf32, #tpu.memory_space<vmem>>, vector<1x128xf32>
    %c9_156 = arith.constant 9 : index
    %c384_157 = arith.constant 384 : index
    %103 = vector.load %arg13[%c9_156, %c384_157] : memref<18x512xf32, #tpu.memory_space<vmem>>, vector<1x128xf32>
    tpu.vector_store %arg13[%c9_156, %c384_157], %102 {strides = array<i32>} : memref<18x512xf32, #tpu.memory_space<vmem>>, vector<1x128xf32>,
    %c10_158 = arith.constant 10 : index
    %c64_159 = arith.constant 64 : index
    %104 = vector.load %arg12[%c10_158, %c64_159] : memref<16x256xf32, #tpu.memory_space<vmem>>, vector<1x128xf32>
    %c10_160 = arith.constant 10 : index
    %c0_161 = arith.constant 0 : index
    %105 = vector.load %arg13[%c10_160, %c0_161] : memref<18x512xf32, #tpu.memory_space<vmem>>, vector<1x128xf32>
    tpu.vector_store %arg13[%c10_160, %c0_161], %104 {strides = array<i32>} : memref<18x512xf32, #tpu.memory_space<vmem>>, vector<1x128xf32>,
    %c11_162 = arith.constant 11 : index
    %c64_163 = arith.constant 64 : index
    %106 = vector.load %arg12[%c11_162, %c64_163] : memref<16x256xf32, #tpu.memory_space<vmem>>, vector<1x128xf32>
    %c10_164 = arith.constant 10 : index
    %c128_165 = arith.constant 128 : index
    %107 = vector.load %arg13[%c10_164, %c128_165] : memref<18x512xf32, #tpu.memory_space<vmem>>, vector<1x128xf32>
    tpu.vector_store %arg13[%c10_164, %c128_165], %106 {strides = array<i32>} : memref<18x512xf32, #tpu.memory_space<vmem>>, vector<1x128xf32>,
    %c12_166 = arith.constant 12 : index
    %c64_167 = arith.constant 64 : index
    %108 = vector.load %arg12[%c12_166, %c64_167] : memref<16x256xf32, #tpu.memory_space<vmem>>, vector<1x128xf32>
    %c10_168 = arith.constant 10 : index
    %c256_169 = arith.constant 256 : index
    %109 = vector.load %arg13[%c10_168, %c256_169] : memref<18x512xf32, #tpu.memory_space<vmem>>, vector<1x128xf32>
    tpu.vector_store %arg13[%c10_168, %c256_169], %108 {strides = array<i32>} : memref<18x512xf32, #tpu.memory_space<vmem>>, vector<1x128xf32>,
    %c13_170 = arith.constant 13 : index
    %c64_171 = arith.constant 64 : index
    %110 = vector.load %arg12[%c13_170, %c64_171] : memref<16x256xf32, #tpu.memory_space<vmem>>, vector<1x128xf32>
    %c10_172 = arith.constant 10 : index
    %c384_173 = arith.constant 384 : index
    %111 = vector.load %arg13[%c10_172, %c384_173] : memref<18x512xf32, #tpu.memory_space<vmem>>, vector<1x128xf32>
    tpu.vector_store %arg13[%c10_172, %c384_173], %110 {strides = array<i32>} : memref<18x512xf32, #tpu.memory_space<vmem>>, vector<1x128xf32>,
    %c12_174 = arith.constant 12 : index
    %c64_175 = arith.constant 64 : index
    %112 = vector.load %arg12[%c12_174, %c64_175] : memref<16x256xf32, #tpu.memory_space<vmem>>, vector<1x128xf32>
    %c11_176 = arith.constant 11 : index
    %c0_177 = arith.constant 0 : index
    %113 = vector.load %arg13[%c11_176, %c0_177] : memref<18x512xf32, #tpu.memory_space<vmem>>, vector<1x128xf32>
    tpu.vector_store %arg13[%c11_176, %c0_177], %112 {strides = array<i32>} : memref<18x512xf32, #tpu.memory_space<vmem>>, vector<1x128xf32>,
    %c13_178 = arith.constant 13 : index
    %c64_179 = arith.constant 64 : index
    %114 = vector.load %arg12[%c13_178, %c64_179] : memref<16x256xf32, #tpu.memory_space<vmem>>, vector<1x128xf32>
    %c11_180 = arith.constant 11 : index
    %c128_181 = arith.constant 128 : index
    %115 = vector.load %arg13[%c11_180, %c128_181] : memref<18x512xf32, #tpu.memory_space<vmem>>, vector<1x128xf32>
    tpu.vector_store %arg13[%c11_180, %c128_181], %114 {strides = array<i32>} : memref<18x512xf32, #tpu.memory_space<vmem>>, vector<1x128xf32>,
    %c14_182 = arith.constant 14 : index
    %c64_183 = arith.constant 64 : index
    %116 = vector.load %arg12[%c14_182, %c64_183] : memref<16x256xf32, #tpu.memory_space<vmem>>, vector<1x128xf32>
    %c11_184 = arith.constant 11 : index
    %c256_185 = arith.constant 256 : index
    %117 = vector.load %arg13[%c11_184, %c256_185] : memref<18x512xf32, #tpu.memory_space<vmem>>, vector<1x128xf32>
    tpu.vector_store %arg13[%c11_184, %c256_185], %116 {strides = array<i32>} : memref<18x512xf32, #tpu.memory_space<vmem>>, vector<1x128xf32>,
    %c15_186 = arith.constant 15 : index
    %c64_187 = arith.constant 64 : index
    %118 = vector.load %arg12[%c15_186, %c64_187] : memref<16x256xf32, #tpu.memory_space<vmem>>, vector<1x128xf32>
    %c11_188 = arith.constant 11 : index
    %c384_189 = arith.constant 384 : index
    %119 = vector.load %arg13[%c11_188, %c384_189] : memref<18x512xf32, #tpu.memory_space<vmem>>, vector<1x128xf32>
    tpu.vector_store %arg13[%c11_188, %c384_189], %118 {strides = array<i32>} : memref<18x512xf32, #tpu.memory_space<vmem>>, vector<1x128xf32>,
    %c0_190 = arith.constant 0 : index
    %c128_191 = arith.constant 128 : index
    %120 = vector.load %arg12[%c0_190, %c128_191] : memref<16x256xf32, #tpu.memory_space<vmem>>, vector<1x128xf32>
    %c12_192 = arith.constant 12 : index
    %c0_193 = arith.constant 0 : index
    %121 = vector.load %arg13[%c12_192, %c0_193] : memref<18x512xf32, #tpu.memory_space<vmem>>, vector<1x128xf32>
    tpu.vector_store %arg13[%c12_192, %c0_193], %120 {strides = array<i32>} : memref<18x512xf32, #tpu.memory_space<vmem>>, vector<1x128xf32>,
    %c1_194 = arith.constant 1 : index
    %c128_195 = arith.constant 128 : index
    %122 = vector.load %arg12[%c1_194, %c128_195] : memref<16x256xf32, #tpu.memory_space<vmem>>, vector<1x128xf32>
    %c12_196 = arith.constant 12 : index
    %c128_197 = arith.constant 128 : index
    %123 = vector.load %arg13[%c12_196, %c128_197] : memref<18x512xf32, #tpu.memory_space<vmem>>, vector<1x128xf32>
    tpu.vector_store %arg13[%c12_196, %c128_197], %122 {strides = array<i32>} : memref<18x512xf32, #tpu.memory_space<vmem>>, vector<1x128xf32>,
    %c2_198 = arith.constant 2 : index
    %c128_199 = arith.constant 128 : index
    %124 = vector.load %arg12[%c2_198, %c128_199] : memref<16x256xf32, #tpu.memory_space<vmem>>, vector<1x128xf32>
    %c12_200 = arith.constant 12 : index
    %c256_201 = arith.constant 256 : index
    %125 = vector.load %arg13[%c12_200, %c256_201] : memref<18x512xf32, #tpu.memory_space<vmem>>, vector<1x128xf32>
    tpu.vector_store %arg13[%c12_200, %c256_201], %124 {strides = array<i32>} : memref<18x512xf32, #tpu.memory_space<vmem>>, vector<1x128xf32>,
    %c3_202 = arith.constant 3 : index
    %c128_203 = arith.constant 128 : index
    %126 = vector.load %arg12[%c3_202, %c128_203] : memref<16x256xf32, #tpu.memory_space<vmem>>, vector<1x128xf32>
    %c12_204 = arith.constant 12 : index
    %c384_205 = arith.constant 384 : index
    %127 = vector.load %arg13[%c12_204, %c384_205] : memref<18x512xf32, #tpu.memory_space<vmem>>, vector<1x128xf32>
    tpu.vector_store %arg13[%c12_204, %c384_205], %126 {strides = array<i32>} : memref<18x512xf32, #tpu.memory_space<vmem>>, vector<1x128xf32>,
    %c2_206 = arith.constant 2 : index
    %c128_207 = arith.constant 128 : index
    %128 = vector.load %arg12[%c2_206, %c128_207] : memref<16x256xf32, #tpu.memory_space<vmem>>, vector<1x128xf32>
    %c13_208 = arith.constant 13 : index
    %c0_209 = arith.constant 0 : index
    %129 = vector.load %arg13[%c13_208, %c0_209] : memref<18x512xf32, #tpu.memory_space<vmem>>, vector<1x128xf32>
    tpu.vector_store %arg13[%c13_208, %c0_209], %128 {strides = array<i32>} : memref<18x512xf32, #tpu.memory_space<vmem>>, vector<1x128xf32>,
    %c3_210 = arith.constant 3 : index
    %c128_211 = arith.constant 128 : index
    %130 = vector.load %arg12[%c3_210, %c128_211] : memref<16x256xf32, #tpu.memory_space<vmem>>, vector<1x128xf32>
    %c13_212 = arith.constant 13 : index
    %c128_213 = arith.constant 128 : index
    %131 = vector.load %arg13[%c13_212, %c128_213] : memref<18x512xf32, #tpu.memory_space<vmem>>, vector<1x128xf32>
    tpu.vector_store %arg13[%c13_212, %c128_213], %130 {strides = array<i32>} : memref<18x512xf32, #tpu.memory_space<vmem>>, vector<1x128xf32>,
    %c4_214 = arith.constant 4 : index
    %c128_215 = arith.constant 128 : index
    %132 = vector.load %arg12[%c4_214, %c128_215] : memref<16x256xf32, #tpu.memory_space<vmem>>, vector<1x128xf32>
    %c13_216 = arith.constant 13 : index
    %c256_217 = arith.constant 256 : index
    %133 = vector.load %arg13[%c13_216, %c256_217] : memref<18x512xf32, #tpu.memory_space<vmem>>, vector<1x128xf32>
    tpu.vector_store %arg13[%c13_216, %c256_217], %132 {strides = array<i32>} : memref<18x512xf32, #tpu.memory_space<vmem>>, vector<1x128xf32>,
    %c5_218 = arith.constant 5 : index
    %c128_219 = arith.constant 128 : index
    %134 = vector.load %arg12[%c5_218, %c128_219] : memref<16x256xf32, #tpu.memory_space<vmem>>, vector<1x128xf32>
    %c13_220 = arith.constant 13 : index
    %c384_221 = arith.constant 384 : index
    %135 = vector.load %arg13[%c13_220, %c384_221] : memref<18x512xf32, #tpu.memory_space<vmem>>, vector<1x128xf32>
    tpu.vector_store %arg13[%c13_220, %c384_221], %134 {strides = array<i32>} : memref<18x512xf32, #tpu.memory_space<vmem>>, vector<1x128xf32>,
    %c4_222 = arith.constant 4 : index
    %c128_223 = arith.constant 128 : index
    %136 = vector.load %arg12[%c4_222, %c128_223] : memref<16x256xf32, #tpu.memory_space<vmem>>, vector<1x128xf32>
    %c14_224 = arith.constant 14 : index
    %c0_225 = arith.constant 0 : index
    %137 = vector.load %arg13[%c14_224, %c0_225] : memref<18x512xf32, #tpu.memory_space<vmem>>, vector<1x128xf32>
    tpu.vector_store %arg13[%c14_224, %c0_225], %136 {strides = array<i32>} : memref<18x512xf32, #tpu.memory_space<vmem>>, vector<1x128xf32>,
    %c5_226 = arith.constant 5 : index
    %c128_227 = arith.constant 128 : index
    %138 = vector.load %arg12[%c5_226, %c128_227] : memref<16x256xf32, #tpu.memory_space<vmem>>, vector<1x128xf32>
    %c14_228 = arith.constant 14 : index
    %c128_229 = arith.constant 128 : index
    %139 = vector.load %arg13[%c14_228, %c128_229] : memref<18x512xf32, #tpu.memory_space<vmem>>, vector<1x128xf32>
    tpu.vector_store %arg13[%c14_228, %c128_229], %138 {strides = array<i32>} : memref<18x512xf32, #tpu.memory_space<vmem>>, vector<1x128xf32>,
    %c6_230 = arith.constant 6 : index
    %c128_231 = arith.constant 128 : index
    %140 = vector.load %arg12[%c6_230, %c128_231] : memref<16x256xf32, #tpu.memory_space<vmem>>, vector<1x128xf32>
    %c14_232 = arith.constant 14 : index
    %c256_233 = arith.constant 256 : index
    %141 = vector.load %arg13[%c14_232, %c256_233] : memref<18x512xf32, #tpu.memory_space<vmem>>, vector<1x128xf32>
    tpu.vector_store %arg13[%c14_232, %c256_233], %140 {strides = array<i32>} : memref<18x512xf32, #tpu.memory_space<vmem>>, vector<1x128xf32>,
    %c7_234 = arith.constant 7 : index
    %c128_235 = arith.constant 128 : index
    %142 = vector.load %arg12[%c7_234, %c128_235] : memref<16x256xf32, #tpu.memory_space<vmem>>, vector<1x128xf32>
    %c14_236 = arith.constant 14 : index
    %c384_237 = arith.constant 384 : index
    %143 = vector.load %arg13[%c14_236, %c384_237] : memref<18x512xf32, #tpu.memory_space<vmem>>, vector<1x128xf32>
    tpu.vector_store %arg13[%c14_236, %c384_237], %142 {strides = array<i32>} : memref<18x512xf32, #tpu.memory_space<vmem>>, vector<1x128xf32>,
    %c8_238 = arith.constant 8 : index
    %c128_239 = arith.constant 128 : index
    %144 = vector.load %arg12[%c8_238, %c128_239] : memref<16x256xf32, #tpu.memory_space<vmem>>, vector<1x128xf32>
    %c15_240 = arith.constant 15 : index
    %c0_241 = arith.constant 0 : index
    %145 = vector.load %arg13[%c15_240, %c0_241] : memref<18x512xf32, #tpu.memory_space<vmem>>, vector<1x128xf32>
    tpu.vector_store %arg13[%c15_240, %c0_241], %144 {strides = array<i32>} : memref<18x512xf32, #tpu.memory_space<vmem>>, vector<1x128xf32>,
    %c9_242 = arith.constant 9 : index
    %c128_243 = arith.constant 128 : index
    %146 = vector.load %arg12[%c9_242, %c128_243] : memref<16x256xf32, #tpu.memory_space<vmem>>, vector<1x128xf32>
    %c15_244 = arith.constant 15 : index
    %c128_245 = arith.constant 128 : index
    %147 = vector.load %arg13[%c15_244, %c128_245] : memref<18x512xf32, #tpu.memory_space<vmem>>, vector<1x128xf32>
    tpu.vector_store %arg13[%c15_244, %c128_245], %146 {strides = array<i32>} : memref<18x512xf32, #tpu.memory_space<vmem>>, vector<1x128xf32>,
    %c10_246 = arith.constant 10 : index
    %c128_247 = arith.constant 128 : index
    %148 = vector.load %arg12[%c10_246, %c128_247] : memref<16x256xf32, #tpu.memory_space<vmem>>, vector<1x128xf32>
    %c15_248 = arith.constant 15 : index
    %c256_249 = arith.constant 256 : index
    %149 = vector.load %arg13[%c15_248, %c256_249] : memref<18x512xf32, #tpu.memory_space<vmem>>, vector<1x128xf32>
    tpu.vector_store %arg13[%c15_248, %c256_249], %148 {strides = array<i32>} : memref<18x512xf32, #tpu.memory_space<vmem>>, vector<1x128xf32>,
    %c11_250 = arith.constant 11 : index
    %c128_251 = arith.constant 128 : index
    %150 = vector.load %arg12[%c11_250, %c128_251] : memref<16x256xf32, #tpu.memory_space<vmem>>, vector<1x128xf32>
    %c15_252 = arith.constant 15 : index
    %c384_253 = arith.constant 384 : index
    %151 = vector.load %arg13[%c15_252, %c384_253] : memref<18x512xf32, #tpu.memory_space<vmem>>, vector<1x128xf32>
    tpu.vector_store %arg13[%c15_252, %c384_253], %150 {strides = array<i32>} : memref<18x512xf32, #tpu.memory_space<vmem>>, vector<1x128xf32>,
    %c10_254 = arith.constant 10 : index
    %c128_255 = arith.constant 128 : index
    %152 = vector.load %arg12[%c10_254, %c128_255] : memref<16x256xf32, #tpu.memory_space<vmem>>, vector<1x128xf32>
    %c16 = arith.constant 16 : index
    %c0_256 = arith.constant 0 : index
    %153 = vector.load %arg13[%c16, %c0_256] : memref<18x512xf32, #tpu.memory_space<vmem>>, vector<1x128xf32>
    tpu.vector_store %arg13[%c16, %c0_256], %152 {strides = array<i32>} : memref<18x512xf32, #tpu.memory_space<vmem>>, vector<1x128xf32>,
    %c11_257 = arith.constant 11 : index
    %c128_258 = arith.constant 128 : index
    %154 = vector.load %arg12[%c11_257, %c128_258] : memref<16x256xf32, #tpu.memory_space<vmem>>, vector<1x128xf32>
    %c16_259 = arith.constant 16 : index
    %c128_260 = arith.constant 128 : index
    %155 = vector.load %arg13[%c16_259, %c128_260] : memref<18x512xf32, #tpu.memory_space<vmem>>, vector<1x128xf32>
    tpu.vector_store %arg13[%c16_259, %c128_260], %154 {strides = array<i32>} : memref<18x512xf32, #tpu.memory_space<vmem>>, vector<1x128xf32>,
    %c12_261 = arith.constant 12 : index
    %c128_262 = arith.constant 128 : index
    %156 = vector.load %arg12[%c12_261, %c128_262] : memref<16x256xf32, #tpu.memory_space<vmem>>, vector<1x128xf32>
    %c16_263 = arith.constant 16 : index
    %c256_264 = arith.constant 256 : index
    %157 = vector.load %arg13[%c16_263, %c256_264] : memref<18x512xf32, #tpu.memory_space<vmem>>, vector<1x128xf32>
    tpu.vector_store %arg13[%c16_263, %c256_264], %156 {strides = array<i32>} : memref<18x512xf32, #tpu.memory_space<vmem>>, vector<1x128xf32>,
    %c13_265 = arith.constant 13 : index
    %c128_266 = arith.constant 128 : index
    %158 = vector.load %arg12[%c13_265, %c128_266] : memref<16x256xf32, #tpu.memory_space<vmem>>, vector<1x128xf32>
    %c16_267 = arith.constant 16 : index
    %c384_268 = arith.constant 384 : index
    %159 = vector.load %arg13[%c16_267, %c384_268] : memref<18x512xf32, #tpu.memory_space<vmem>>, vector<1x128xf32>
    tpu.vector_store %arg13[%c16_267, %c384_268], %158 {strides = array<i32>} : memref<18x512xf32, #tpu.memory_space<vmem>>, vector<1x128xf32>,
    %c12_269 = arith.constant 12 : index
    %c128_270 = arith.constant 128 : index
    %160 = vector.load %arg12[%c12_269, %c128_270] : memref<16x256xf32, #tpu.memory_space<vmem>>, vector<1x128xf32>
    %c17 = arith.constant 17 : index
    %c0_271 = arith.constant 0 : index
    %161 = vector.load %arg13[%c17, %c0_271] : memref<18x512xf32, #tpu.memory_space<vmem>>, vector<1x128xf32>
    tpu.vector_store %arg13[%c17, %c0_271], %160 {strides = array<i32>} : memref<18x512xf32, #tpu.memory_space<vmem>>, vector<1x128xf32>,
    %c13_272 = arith.constant 13 : index
    %c128_273 = arith.constant 128 : index
    %162 = vector.load %arg12[%c13_272, %c128_273] : memref<16x256xf32, #tpu.memory_space<vmem>>, vector<1x128xf32>
    %c17_274 = arith.constant 17 : index
    %c128_275 = arith.constant 128 : index
    %163 = vector.load %arg13[%c17_274, %c128_275] : memref<18x512xf32, #tpu.memory_space<vmem>>, vector<1x128xf32>
    tpu.vector_store %arg13[%c17_274, %c128_275], %162 {strides = array<i32>} : memref<18x512xf32, #tpu.memory_space<vmem>>, vector<1x128xf32>,
    %c14_276 = arith.constant 14 : index
    %c128_277 = arith.constant 128 : index
    %164 = vector.load %arg12[%c14_276, %c128_277] : memref<16x256xf32, #tpu.memory_space<vmem>>, vector<1x128xf32>
    %c17_278 = arith.constant 17 : index
    %c256_279 = arith.constant 256 : index
    %165 = vector.load %arg13[%c17_278, %c256_279] : memref<18x512xf32, #tpu.memory_space<vmem>>, vector<1x128xf32>
    tpu.vector_store %arg13[%c17_278, %c256_279], %164 {strides = array<i32>} : memref<18x512xf32, #tpu.memory_space<vmem>>, vector<1x128xf32>,
    %c15_280 = arith.constant 15 : index
    %c128_281 = arith.constant 128 : index
    %166 = vector.load %arg12[%c15_280, %c128_281] : memref<16x256xf32, #tpu.memory_space<vmem>>, vector<1x128xf32>
    %c17_282 = arith.constant 17 : index
    %c384_283 = arith.constant 384 : index
    %167 = vector.load %arg13[%c17_282, %c384_283] : memref<18x512xf32, #tpu.memory_space<vmem>>, vector<1x128xf32>
    tpu.vector_store %arg13[%c17_282, %c384_283], %166 {strides = array<i32>} : memref<18x512xf32, #tpu.memory_space<vmem>>, vector<1x128xf32>,
    %c0_284 = arith.constant 0 : index
    %c0_285 = arith.constant 0 : index
    %168 = vector.load %arg13[%c0_284, %c0_285] : memref<18x512xf32, #tpu.memory_space<vmem>>, vector<18x512xf32>
    %169 = arith.truncf %168 : vector<18x512xf32> to vector<18x512xbf16>
    %c0_286 = arith.constant 0 : index
    %c0_287 = arith.constant 0 : index
    %170 = vector.load %arg3[%c0_286, %c0_287] : memref<512x64xbf16, #tpu.memory_space<vmem>>, vector<512x64xbf16>
    %cst_288 = arith.constant dense<0.000000e+00> : vector<18x64xf32>
    %171 = tpu.matmul %169, %170, %cst_288 {dimension_numbers = #tpu.dot_dimension_numbers<[1], [0], [0], [1], [0, 0, 1, 1], [], []>} : vector<18x512xbf16>, vector<512x64xbf16>, vector<18x64xf32> -> vector<18x64xf32>
    %c0_289 = arith.constant 0 : index
    %c0_290 = arith.constant 0 : index
    %172 = vector.load %arg4[%c0_289, %c0_290] : memref<1x64xf32, #tpu.memory_space<vmem>>, vector<1x64xf32>
    %173 = vector.broadcast %172 : vector<1x64xf32> to vector<18x64xf32>
    %174 = arith.addf %171, %173 : vector<18x64xf32>
    %cst_291 = arith.constant 0.000000e+00 : f32
    %175 = vector.broadcast %cst_291 : f32 to vector<18x64xf32>
    %176 = arith.maximumf %174, %175 : vector<18x64xf32>
    %177 = vector.extract_strided_slice %176 {offsets = [0, 0], sizes = [6, 64], strides = [1, 1]} : vector<18x64xf32> to vector<6x64xf32>
    %c0_292 = arith.constant 0 : index
    %c0_293 = arith.constant 0 : index
    %178 = vector.load %arg14[%c0_292, %c0_293] : memref<6x192xf32, #tpu.memory_space<vmem>>, vector<6x64xf32>
    tpu.vector_store %arg14[%c0_292, %c0_293], %177 {strides = array<i32>} : memref<6x192xf32, #tpu.memory_space<vmem>>, vector<6x64xf32>,
    %179 = vector.extract_strided_slice %176 {offsets = [6, 0], sizes = [6, 64], strides = [1, 1]} : vector<18x64xf32> to vector<6x64xf32>
    %c0_294 = arith.constant 0 : index
    %c64_295 = arith.constant 64 : index
    %180 = vector.load %arg14[%c0_294, %c64_295] : memref<6x192xf32, #tpu.memory_space<vmem>>, vector<6x64xf32>
    tpu.vector_store %arg14[%c0_294, %c64_295], %179 {strides = array<i32>} : memref<6x192xf32, #tpu.memory_space<vmem>>, vector<6x64xf32>,
    %181 = vector.extract_strided_slice %176 {offsets = [12, 0], sizes = [6, 64], strides = [1, 1]} : vector<18x64xf32> to vector<6x64xf32>
    %c0_296 = arith.constant 0 : index
    %c128_297 = arith.constant 128 : index
    %182 = vector.load %arg14[%c0_296, %c128_297] : memref<6x192xf32, #tpu.memory_space<vmem>>, vector<6x64xf32>
    tpu.vector_store %arg14[%c0_296, %c128_297], %181 {strides = array<i32>} : memref<6x192xf32, #tpu.memory_space<vmem>>, vector<6x64xf32>,
    %c0_298 = arith.constant 0 : index
    %c0_299 = arith.constant 0 : index
    %183 = vector.load %arg14[%c0_298, %c0_299] : memref<6x192xf32, #tpu.memory_space<vmem>>, vector<1x192xf32>
    %c0_300 = arith.constant 0 : index
    %c0_301 = arith.constant 0 : index
    %184 = vector.load %arg15[%c0_300, %c0_301] : memref<2x576xf32, #tpu.memory_space<vmem>>, vector<1x192xf32>
    tpu.vector_store %arg15[%c0_300, %c0_301], %183 {strides = array<i32>} : memref<2x576xf32, #tpu.memory_space<vmem>>, vector<1x192xf32>,
    %c1_302 = arith.constant 1 : index
    %c0_303 = arith.constant 0 : index
    %185 = vector.load %arg14[%c1_302, %c0_303] : memref<6x192xf32, #tpu.memory_space<vmem>>, vector<1x192xf32>
    %c0_304 = arith.constant 0 : index
    %c192_305 = arith.constant 192 : index
    %186 = vector.load %arg15[%c0_304, %c192_305] : memref<2x576xf32, #tpu.memory_space<vmem>>, vector<1x192xf32>
    tpu.vector_store %arg15[%c0_304, %c192_305], %185 {strides = array<i32>} : memref<2x576xf32, #tpu.memory_space<vmem>>, vector<1x192xf32>,
    %c2_306 = arith.constant 2 : index
    %c0_307 = arith.constant 0 : index
    %187 = vector.load %arg14[%c2_306, %c0_307] : memref<6x192xf32, #tpu.memory_space<vmem>>, vector<1x192xf32>
    %c0_308 = arith.constant 0 : index
    %c384_309 = arith.constant 384 : index
    %188 = vector.load %arg15[%c0_308, %c384_309] : memref<2x576xf32, #tpu.memory_space<vmem>>, vector<1x192xf32>
    tpu.vector_store %arg15[%c0_308, %c384_309], %187 {strides = array<i32>} : memref<2x576xf32, #tpu.memory_space<vmem>>, vector<1x192xf32>,
    %c3_310 = arith.constant 3 : index
    %c0_311 = arith.constant 0 : index
    %189 = vector.load %arg14[%c3_310, %c0_311] : memref<6x192xf32, #tpu.memory_space<vmem>>, vector<1x192xf32>
    %c1_312 = arith.constant 1 : index
    %c0_313 = arith.constant 0 : index
    %190 = vector.load %arg15[%c1_312, %c0_313] : memref<2x576xf32, #tpu.memory_space<vmem>>, vector<1x192xf32>
    tpu.vector_store %arg15[%c1_312, %c0_313], %189 {strides = array<i32>} : memref<2x576xf32, #tpu.memory_space<vmem>>, vector<1x192xf32>,
    %c4_314 = arith.constant 4 : index
    %c0_315 = arith.constant 0 : index
    %191 = vector.load %arg14[%c4_314, %c0_315] : memref<6x192xf32, #tpu.memory_space<vmem>>, vector<1x192xf32>
    %c1_316 = arith.constant 1 : index
    %c192_317 = arith.constant 192 : index
    %192 = vector.load %arg15[%c1_316, %c192_317] : memref<2x576xf32, #tpu.memory_space<vmem>>, vector<1x192xf32>
    tpu.vector_store %arg15[%c1_316, %c192_317], %191 {strides = array<i32>} : memref<2x576xf32, #tpu.memory_space<vmem>>, vector<1x192xf32>,
    %c5_318 = arith.constant 5 : index
    %c0_319 = arith.constant 0 : index
    %193 = vector.load %arg14[%c5_318, %c0_319] : memref<6x192xf32, #tpu.memory_space<vmem>>, vector<1x192xf32>
    %c1_320 = arith.constant 1 : index
    %c384_321 = arith.constant 384 : index
    %194 = vector.load %arg15[%c1_320, %c384_321] : memref<2x576xf32, #tpu.memory_space<vmem>>, vector<1x192xf32>
    tpu.vector_store %arg15[%c1_320, %c384_321], %193 {strides = array<i32>} : memref<2x576xf32, #tpu.memory_space<vmem>>, vector<1x192xf32>,
    %c0_322 = arith.constant 0 : index
    %c0_323 = arith.constant 0 : index
    %195 = vector.load %arg15[%c0_322, %c0_323] : memref<2x576xf32, #tpu.memory_space<vmem>>, vector<2x576xf32>
    %196 = arith.truncf %195 : vector<2x576xf32> to vector<2x576xbf16>
    %c0_324 = arith.constant 0 : index
    %c0_325 = arith.constant 0 : index
    %197 = vector.load %arg5[%c0_324, %c0_325] : memref<576x64xbf16, #tpu.memory_space<vmem>>, vector<576x64xbf16>
    %cst_326 = arith.constant dense<0.000000e+00> : vector<2x64xf32>
    %198 = tpu.matmul %196, %197, %cst_326 {dimension_numbers = #tpu.dot_dimension_numbers<[1], [0], [0], [1], [0, 0, 1, 1], [], []>} : vector<2x576xbf16>, vector<576x64xbf16>, vector<2x64xf32> -> vector<2x64xf32>
    %c0_327 = arith.constant 0 : index
    %c0_328 = arith.constant 0 : index
    %199 = vector.load %arg6[%c0_327, %c0_328] : memref<1x64xf32, #tpu.memory_space<vmem>>, vector<1x64xf32>
    %200 = vector.broadcast %199 : vector<1x64xf32> to vector<2x64xf32>
    %201 = arith.addf %198, %200 : vector<2x64xf32>
    %cst_329 = arith.constant 0.000000e+00 : f32
    %202 = vector.broadcast %cst_329 : f32 to vector<2x64xf32>
    %203 = arith.maximumf %201, %202 : vector<2x64xf32>
    %204 = arith.truncf %203 : vector<2x64xf32> to vector<2x64xbf16>
    %c0_330 = arith.constant 0 : index
    %c0_331 = arith.constant 0 : index
    %205 = vector.load %arg7[%c0_330, %c0_331] : memref<64x512xbf16, #tpu.memory_space<vmem>>, vector<64x512xbf16>
    %cst_332 = arith.constant dense<0.000000e+00> : vector<2x512xf32>
    %206 = tpu.matmul %204, %205, %cst_332 {dimension_numbers = #tpu.dot_dimension_numbers<[1], [0], [0], [1], [0, 0, 1, 1], [], []>} : vector<2x64xbf16>, vector<64x512xbf16>, vector<2x512xf32> -> vector<2x512xf32>
    %c0_333 = arith.constant 0 : index
    %c0_334 = arith.constant 0 : index
    %207 = vector.load %arg8[%c0_333, %c0_334] : memref<1x512xf32, #tpu.memory_space<vmem>>, vector<1x512xf32>
    %208 = vector.broadcast %207 : vector<1x512xf32> to vector<2x512xf32>
    %209 = arith.addf %206, %208 : vector<2x512xf32>
    %cst_335 = arith.constant 0.000000e+00 : f32
    %210 = vector.broadcast %cst_335 : f32 to vector<2x512xf32>
    %211 = arith.maximumf %209, %210 : vector<2x512xf32>
    %212 = arith.truncf %211 : vector<2x512xf32> to vector<2x512xbf16>
    %c0_336 = arith.constant 0 : index
    %c0_337 = arith.constant 0 : index
    %213 = vector.load %arg9[%c0_336, %c0_337] : memref<512x128xbf16, #tpu.memory_space<vmem>>, vector<512x128xbf16>
    %cst_338 = arith.constant dense<0.000000e+00> : vector<2x128xf32>
    %214 = tpu.matmul %212, %213, %cst_338 {dimension_numbers = #tpu.dot_dimension_numbers<[1], [0], [0], [1], [0, 0, 1, 1], [], []>} : vector<2x512xbf16>, vector<512x128xbf16>, vector<2x128xf32> -> vector<2x128xf32>
    %c0_339 = arith.constant 0 : index
    %c0_340 = arith.constant 0 : index
    %215 = vector.load %arg10[%c0_339, %c0_340] : memref<1x128xf32, #tpu.memory_space<vmem>>, vector<1x128xf32>
    %216 = vector.broadcast %215 : vector<1x128xf32> to vector<2x128xf32>
    %217 = arith.addf %214, %216 : vector<2x128xf32>
    %c0_341 = arith.constant 0 : index
    %c0_342 = arith.constant 0 : index
    %218 = vector.load %arg11[%c0_341, %c0_342] : memref<2x128xf32, #tpu.memory_space<vmem>>, vector<2x128xf32>
    tpu.vector_store %arg11[%c0_341, %c0_342], %217 {strides = array<i32>} : memref<2x128xf32, #tpu.memory_space<vmem>>, vector<2x128xf32>,
    return
  }
}

</mosaic_0001>

<bundles_post_ra>
// kernel: conv_dqn_forward.1
= control target key start
LH: loop header
LB: loop body
LE: loop exit
PB: predicated region body
PF: predicated region fallthrough
CT: control target
= control target key end

     0   :  { %s3659_s0 = inlined_call_operand.vmem [shape: bf16[128,256], index: 0, kind: input, shape index: {}]   ;;  %s3660_s1 = inlined_call_operand.vmem [shape: bf16[256,32], index: 1, kind: input, shape index: {}]   ;;  %s3661_s2 = inlined_call_operand.vmem [shape: f32[1,32], index: 2, kind: input, shape index: {}]   ;;  %s3662_s3 = inlined_call_operand.vmem [shape: bf16[512,64], index: 3, kind: input, shape index: {}]   ;;  %s3663_s4 = inlined_call_operand.vmem [shape: f32[1,64], index: 4, kind: input, shape index: {}]   ;;  %s3664_s5 = inlined_call_operand.vmem [shape: bf16[576,64], index: 5, kind: input, shape index: {}]   ;;  %s3665_s6 = inlined_call_operand.vmem [shape: f32[1,64], index: 6, kind: input, shape index: {}]   ;;  %s3666_s7 = inlined_call_operand.vmem [shape: bf16[64,512], index: 7, kind: input, shape index: {}]   ;;  %s3667_s8 = inlined_call_operand.vmem [shape: f32[1,512], index: 8, kind: input, shape index: {}]   ;;  %s3668_s9 = inlined_call_operand.vmem [shape: bf16[512,128], index: 9, kind: input, shape index: {}]   ;;  %s3669_s10 = inlined_call_operand.vmem [shape: f32[1,128], index: 10, kind: input, shape index: {}]   ;;  %s3670_s11 = inlined_call_operand.hbm [shape: f32[2,128], index: 11, kind: output, shape index: {}]  }
   0x1   :  { %v2672_v0 = vld [vmem:[%s3660_s1 + $0x40] sm:$0xff]   ;;  %v2674_v2 = vld [vmem:[%s3660_s1 + $0x48] sm:$0xff]   ;;  %v2676_v4 = vld [vmem:[%s3660_s1 + $0x50] sm:$0xff]  }
   0x2   :  { %v2673_v1 = vld [vmem:[%s3660_s1] sm:$0xff]   ;;  %2439 = vmatprep.subr.bf16.mxu0 %v2672_v0  ;;  %v2675_v3 = vld [vmem:[%s3660_s1 + $0x8] sm:$0xff]   ;;  %v2677_v5 = vld [vmem:[%s3660_s1 + $0x10] sm:$0xff]  }
   0x3   :  { %2440 = vmatpush3.bf16.msra.mxu0 %v2673_v1  ;;  %v2678_v6 = vld [vmem:[%s3660_s1 + $0x58] sm:$0xff]   ;;  %v2680_v8 = vld [vmem:[%s3660_s1 + $0x60] sm:$0xff]   ;;  %v2682_v10 = vld [vmem:[%s3660_s1 + $0x68] sm:$0xff]  }
   0x4   :  { %2441 = vmatprep.subr.bf16.mxu0 %v2674_v2  ;;  %v2679_v7 = vld [vmem:[%s3660_s1 + $0x18] sm:$0xff]   ;;  %v2681_v9 = vld [vmem:[%s3660_s1 + $0x20] sm:$0xff]   ;;  %v2683_v12 = vld [vmem:[%s3660_s1 + $0x28] sm:$0xff]  }
   0x5   :  { %v2690_v11 = vld [vmem:[%s3659_s0 + $0x4] ss:$8 sps:$4 sm:$0xff]   ;;  %v2684_v13 = vld [vmem:[%s3660_s1 + $0x70] sm:$0xff]   ;;  %v2686_v15 = vld [vmem:[%s3660_s1 + $0x78] sm:$0xff]  }
   0x6   :  { %303 = vmatprep.mubr.bf16.mxu0 %v2690_v11  ;;  %v2685_v14 = vld [vmem:[%s3660_s1 + $0x30] sm:$0xff]   ;;  %v2687_v16 = vld [vmem:[%s3660_s1 + $0x38] sm:$0xff]   ;;  %v2688_v17 = vld [vmem:[%s3659_s0] ss:$8 sps:$4 sm:$0xff]  }
   0x7   :  { %2442 = vmatpush3.bf16.msra.mxu0 %v2675_v3  ;;  %v2691_v18 = vld [vmem:[%s3659_s0 + $0x14] ss:$8 sps:$4 sm:$0xff]   ;;  %v2693_v19 = vld [vmem:[%s3659_s0 + $0x10] ss:$8 sps:$4 sm:$0xff]   ;;  %v2694_v20 = vld [vmem:[%s3659_s0 + $0x24] ss:$8 sps:$4 sm:$0xff]  }
   0x8   :  { %2443 = vmatprep.subr.bf16.mxu0 %v2676_v4  ;;  %v2696_v21 = vld [vmem:[%s3659_s0 + $0x20] ss:$8 sps:$4 sm:$0xff]   ;;  %v2697_v22 = vld [vmem:[%s3659_s0 + $0x34] ss:$8 sps:$4 sm:$0xff]   ;;  %v2699_v23 = vld [vmem:[%s3659_s0 + $0x30] ss:$8 sps:$4 sm:$0xff]  }
   0x9   :  { %v2700_v24 = vld [vmem:[%s3659_s0 + $0x44] ss:$8 sps:$4 sm:$0xff]   ;;  %v2702_v25 = vld [vmem:[%s3659_s0 + $0x40] ss:$8 sps:$4 sm:$0xff]   ;;  %v2703_v26 = vld [vmem:[%s3659_s0 + $0x54] ss:$8 sps:$4 sm:$0xff]  }
   0xa   :  { %v2705_v27 = vld [vmem:[%s3659_s0 + $0x50] ss:$8 sps:$4 sm:$0xff]   ;;  %v2706_v28 = vld [vmem:[%s3659_s0 + $0x64] ss:$8 sps:$4 sm:$0xff]   ;;  %v2708_v29 = vld [vmem:[%s3659_s0 + $0x60] ss:$8 sps:$4 sm:$0xff]  }
   0xb   :  { %2444 = vmatpush3.bf16.msra.mxu0 %v2677_v5  ;;  %v2709_v30 = vld [vmem:[%s3659_s0 + $0x74] ss:$8 sps:$4 sm:$0xff]   ;;  %v2711_v31 = vld [vmem:[%s3659_s0 + $0x70] ss:$8 sps:$4 sm:$0xff]  }
   0xc   :  { %2445 = vmatprep.subr.bf16.mxu0 %v2678_v6 }
   0xf   :  { %2446 = vmatpush3.bf16.msra.mxu0 %v2679_v7 }
  0x10   :  { %2447 = vmatprep.subr.bf16.mxu0 %v2680_v8 }
  0x13   :  { %2448 = vmatpush3.bf16.msra.mxu0 %v2681_v9 }
  0x14   :  { %2449 = vmatprep.subr.bf16.mxu0 %v2682_v10 }
  0x17   :  { %2450 = vmatpush3.bf16.msra.mxu0 %v2683_v12 }
  0x18   :  { %2451 = vmatprep.subr.bf16.mxu0 %v2684_v13 }
  0x1b   :  { %2452 = vmatpush3.bf16.msra.mxu0 %v2685_v14 }
  0x1c   :  { %2453 = vmatprep.subr.bf16.mxu0 %v2686_v15 }
  0x1f   :  { %2454 = vmatpush3.bf16.msra.mxu0 %v2687_v16 }
  0x22   :  { %304 = vmatmul.mubr.bf16.vlgmr.msra.gmra.mrb[0].mxu0 %v2688_v17 }
  0x23   :  { %311 = vmatprep.mubr.bf16.mxu0 %v2691_v18 }
  0x2a   :  { %312 = vmatmul.mubr.bf16.gmra.mrb[4].mxu0 %v2693_v19 }
  0x2b   :  { %319 = vmatprep.mubr.bf16.mxu0 %v2694_v20 }
  0x32   :  { %320 = vmatmul.mubr.bf16.gmra.mrb[8].mxu0 %v2696_v21 }
  0x33   :  { %327 = vmatprep.mubr.bf16.mxu0 %v2697_v22 }
  0x3a   :  { %328 = vmatmul.mubr.bf16.gmra.mrb[12].mxu0 %v2699_v23 }
  0x3b   :  { %335 = vmatprep.mubr.bf16.mxu0 %v2700_v24 }
  0x42   :  { %336 = vmatmul.mubr.bf16.gmra.mrb[16].mxu0 %v2702_v25 }
  0x43   :  { %343 = vmatprep.mubr.bf16.mxu0 %v2703_v26 }
  0x4a   :  { %344 = vmatmul.mubr.bf16.gmra.mrb[20].mxu0 %v2705_v27 }
  0x4b   :  { %351 = vmatprep.mubr.bf16.mxu0 %v2706_v28 }
  0x52   :  { %352 = vmatmul.mubr.bf16.gmra.mrb[24].mxu0 %v2708_v29 }
  0x53   :  { %359 = vmatprep.mubr.bf16.mxu0 %v2709_v30 }
  0x5a   :  { %360 = vmatmul.mubr.bf16.gmra.mrb[28].mxu0 %v2711_v31 }
  0x5b   :  { %16 = vsyncpa [#allocation7], 0  ;;  %v3028_v33 = vld [vmem:[%s3661_s2] ss:$0 sm:$0xff]  ;;  %vm384_vm0 = vcmask 261120   ;;  %s2861_s0 = smov 32  }
  0x5c   :  { %s2862_s2 = smov 64   ;;  %s2863_s24 = smov 96   ;;  %vm395_vm1 = vcmask 523520   ;;  %vm406_vm2 = vcmask 785920   ;;  %vm417_vm3 = vcmask 1048320   ;;  %vm508_vm4 = vcmask 523264  }
  0x5d   :  { %vm1195_vm5 = vcmask 521216   ;;  %vm1199_vm6 = vcmask 1041408   ;;  %vm1209_vm7 = vcmask 1043456   ;;  %vm1206_vm8 = vcmask 1046016  }
  0x5e   :  { %vm2866_vm13 = vmmov 0  }
  0xf5   :  { %v2455_v32 = vpop.f32.mrb[0].mxu0 }
  0xf6   :  { %v2456_v34 = vpop.f32.mrb[1].mxu0 }
  0xf7   :  { %v2457_v35 = vadd.f32 %v2456_v34, %v2455_v32  ;;  %v2458_v36 = vpop.f32.mrb[2].mxu0 }
  0xf8   :  { %v2459_v37 = vpop.f32.mrb[3].mxu0 }
  0xf9   :  { %v306_v38 = vadd.f32 %v2457_v35, %v3028_v33  ;;  %v2460_v39 = vadd.f32 %v2459_v37, %v2458_v36 }
  0xfb   :  { %v368_v40 = vmax.f32 %v306_v38, 0.0  ;;  %v309_v41 = vadd.f32 %v2460_v39, %v3028_v33 }
  0xfd   :  { %v369_v42 = vmax.f32 %v309_v41, 0.0  ;;  %v2461_v43 = vpop.f32.mrb[4].mxu0  ;;  %385 = vst.msk [vmem:[#allocation2] sm:$0xff] %vm384_vm0, %v368_v40 }
  0xfe   :  { %v2462_v44 = vpop.f32.mrb[5].mxu0 }
  0xff   :  { %v2463_v45 = vadd.f32 %v2462_v44, %v2461_v43  ;;  %v2464_v46 = vpop.f32.mrb[6].mxu0  ;;  %386 = vst.msk [vmem:[#allocation2 + $0x10] sm:$0xff] %vm384_vm0, %v369_v42 }
 0x100   :  { %v2465_v47 = vpop.f32.mrb[7].mxu0 }
 0x101   :  { %v2466_v48 = vadd.f32 %v2465_v47, %v2464_v46  ;;  %v314_v49 = vadd.f32 %v2463_v45, %v3028_v33 }
 0x103   :  { %v317_v50 = vadd.f32 %v2466_v48, %v3028_v33  ;;  %v370_v51 = vmax.f32 %v314_v49, 0.0 }
 0x105   :  { %v2467_v52 = vpop.f32.mrb[8].mxu0  ;;  %389 = vrot.lane.b32.xlu0 %v370_v51, %s2861_s0  ;;  %v371_v54 = vmax.f32 %v317_v50, 0.0 }
 0x106   :  { %v2468_v53 = vpop.f32.mrb[9].mxu0 }
 0x107   :  { %v2469_v55 = vadd.f32 %v2468_v53, %v2467_v52  ;;  %v2470_v56 = vpop.f32.mrb[10].mxu0 }
 0x108   :  { %v2471_v57 = vpop.f32.mrb[11].mxu0 }
 0x109   :  { %v322_v58 = vadd.f32 %v2469_v55, %v3028_v33  ;;  %v2472_v59 = vadd.f32 %v2471_v57, %v2470_v56  ;;  %391 = vrot.lane.b32.xlu0 %v371_v54, %s2861_s0 }
 0x10b   :  { %v372_v60 = vmax.f32 %v322_v58, 0.0  ;;  %v325_v61 = vadd.f32 %v2472_v59, %v3028_v33 }
 0x10d   :  { %v2473_v62 = vpop.f32.mrb[12].mxu0  ;;  %400 = vrot.lane.b32.xlu0 %v372_v60, %s2862_s2  ;;  %v373_v63 = vmax.f32 %v325_v61, 0.0 }
 0x10e   :  { %v2474_v0 = vpop.f32.mrb[13].mxu0 }
 0x10f   :  { %v2475_v1 = vadd.f32 %v2474_v0, %v2473_v62  ;;  %v2476_v2 = vpop.f32.mrb[14].mxu0  ;;  %402 = vrot.lane.b32.xlu1 %v373_v63, %s2862_s2 }
 0x110   :  { %v2477_v3 = vpop.f32.mrb[15].mxu0 }
 0x111   :  { %v330_v4 = vadd.f32 %v2475_v1, %v3028_v33  ;;  %v2478_v5 = vadd.f32 %v2477_v3, %v2476_v2 }
 0x113   :  { %v374_v6 = vmax.f32 %v330_v4, 0.0  ;;  %v333_v7 = vadd.f32 %v2478_v5, %v3028_v33 }
 0x115   :  { %v375_v8 = vmax.f32 %v333_v7, 0.0  ;;  %v2479_v9 = vpop.f32.mrb[16].mxu0  ;;  %411 = vrot.lane.b32.xlu0 %v374_v6, %s2863_s24 }
 0x116   :  { %v2480_v10 = vpop.f32.mrb[17].mxu0 }
 0x117   :  { %v2481_v11 = vadd.f32 %v2480_v10, %v2479_v9  ;;  %v2482_v12 = vpop.f32.mrb[18].mxu0  ;;  %413 = vrot.lane.b32.xlu1 %v375_v8, %s2863_s24 }
 0x118   :  { %v2483_v13 = vpop.f32.mrb[19].mxu0 }
 0x119   :  { %v338_v14 = vadd.f32 %v2481_v11, %v3028_v33  ;;  %v2484_v15 = vadd.f32 %v2483_v13, %v2482_v12 }
 0x11b   :  { %v376_v16 = vmax.f32 %v338_v14, 0.0  ;;  %v341_v17 = vadd.f32 %v2484_v15, %v3028_v33 }
 0x11d   :  { %v377_v18 = vmax.f32 %v341_v17, 0.0  ;;  %v2485_v19 = vpop.f32.mrb[20].mxu0  ;;  %420 = vst.msk [vmem:[#allocation2 + $0x8] sm:$0xff] %vm384_vm0, %v376_v16 }
 0x11e   :  { %v2486_v20 = vpop.f32.mrb[21].mxu0 }
 0x11f   :  { %v2487_v21 = vadd.f32 %v2486_v20, %v2485_v19  ;;  %v2488_v22 = vpop.f32.mrb[22].mxu0  ;;  %421 = vst.msk [vmem:[#allocation2 + $0x18] sm:$0xff] %vm384_vm0, %v377_v18 }
 0x120   :  { %v2489_v23 = vpop.f32.mrb[23].mxu0 }
 0x121   :  { %v346_v24 = vadd.f32 %v2487_v21, %v3028_v33  ;;  %v2490_v25 = vadd.f32 %v2489_v23, %v2488_v22 }
 0x123   :  { %v378_v26 = vmax.f32 %v346_v24, 0.0  ;;  %v349_v27 = vadd.f32 %v2490_v25, %v3028_v33 }
 0x125   :  { %v2491_v28 = vpop.f32.mrb[24].mxu0  ;;  %424 = vrot.lane.b32.xlu1 %v378_v26, %s2861_s0  ;;  %v379_v30 = vmax.f32 %v349_v27, 0.0 }
 0x126   :  { %v2492_v29 = vpop.f32.mrb[25].mxu0 }
 0x127   :  { %v2493_v31 = vadd.f32 %v2492_v29, %v2491_v28  ;;  %v2494_v32 = vpop.f32.mrb[26].mxu0  ;;  %v2712_v29 = vld [vmem:[%s3662_s3 + $0x40] sm:$0xff]  }
 0x128   :  { %v2495_v34 = vpop.f32.mrb[27].mxu0  ;;  %2503 = vmatprep.subr.bf16.mxu1 %v2712_v29 }
 0x129   :  { %v354_v35 = vadd.f32 %v2493_v31, %v3028_v33  ;;  %v2496_v36 = vadd.f32 %v2495_v34, %v2494_v32  ;;  %426 = vrot.lane.b32.xlu1 %v379_v30, %s2861_s0  ;;  %v2713_v30 = vld [vmem:[%s3662_s3] sm:$0xff]   ;;  %v2714_v31 = vld [vmem:[%s3662_s3 + $0x48] sm:$0xff]   ;;  %v2716_v34 = vld [vmem:[%s3662_s3 + $0x50] sm:$0xff]  }
 0x12a   :  { %2504 = vmatpush3.bf16.msra.mxu1 %v2713_v30  ;;  %v2715_v32 = vld [vmem:[%s3662_s3 + $0x8] sm:$0xff]  }
 0x12b   :  { %v380_v37 = vmax.f32 %v354_v35, 0.0  ;;  %v357_v38 = vadd.f32 %v2496_v36, %v3028_v33  ;;  %2505 = vmatprep.subr.bf16.mxu1 %v2714_v31  ;;  %v2717_v35 = vld [vmem:[%s3662_s3 + $0x10] sm:$0xff]   ;;  %v2718_v36 = vld [vmem:[%s3662_s3 + $0x58] sm:$0xff]  }
 0x12d   :  { %v381_v39 = vmax.f32 %v357_v38, 0.0  ;;  %v2497_v40 = vpop.f32.mrb[28].mxu0  ;;  %434 = vrot.lane.b32.xlu0 %v380_v37, %s2862_s2  ;;  %v2719_v37 = vld [vmem:[%s3662_s3 + $0x18] sm:$0xff]   ;;  %v2720_v38 = vld [vmem:[%s3662_s3 + $0x60] sm:$0xff]  }
 0x12e   :  { %v2498_v41 = vpop.f32.mrb[29].mxu0  ;;  %2506 = vmatpush3.bf16.msra.mxu1 %v2715_v32 }
 0x12f   :  { %v2499_v42 = vadd.f32 %v2498_v41, %v2497_v40  ;;  %v2500_v43 = vpop.f32.mrb[30].mxu0  ;;  %436 = vrot.lane.b32.xlu1 %v381_v39, %s2862_s2  ;;  %2507 = vmatprep.subr.bf16.mxu1 %v2716_v34  ;;  %v2721_v39 = vld [vmem:[%s3662_s3 + $0x20] sm:$0xff]   ;;  %v2722_v40 = vld [vmem:[%s3662_s3 + $0x68] sm:$0xff]  }
 0x130   :  { %v2501_v44 = vpop.f32.mrb[31].mxu0  ;;  %v2723_v41 = vld [vmem:[%s3662_s3 + $0x28] sm:$0xff]  }
 0x131   :  { %v362_v45 = vadd.f32 %v2499_v42, %v3028_v33  ;;  %v2502_v46 = vadd.f32 %v2501_v44, %v2500_v43  ;;  %v2724_v42 = vld [vmem:[%s3662_s3 + $0x70] sm:$0xff]   ;;  %v2726_v44 = vld [vmem:[%s3662_s3 + $0x78] sm:$0xff]  }
 0x132   :  { %2508 = vmatpush3.bf16.msra.mxu1 %v2717_v35  ;;  %v2725_v43 = vld [vmem:[%s3662_s3 + $0x30] sm:$0xff]  }
 0x133   :  { %v382_v47 = vmax.f32 %v362_v45, 0.0  ;;  %v365_v48 = vadd.f32 %v2502_v46, %v3028_v33  ;;  %2509 = vmatprep.subr.bf16.mxu1 %v2718_v36  ;;  %v2727_v45 = vld [vmem:[%s3662_s3 + $0x38] sm:$0xff]   ;;  %v2728_v46 = vld [vmem:[%s3662_s3 + $0xc0] sm:$0xff]  }
 0x135   :  { %v383_v49 = vmax.f32 %v365_v48, 0.0  ;;  %444 = vrot.lane.b32.xlu0 %v382_v47, %s2863_s24 }
 0x136   :  { %2510 = vmatpush3.bf16.msra.mxu1 %v2719_v37 }
 0x137   :  { %446 = vrot.lane.b32.xlu1 %v383_v49, %s2863_s24  ;;  %2511 = vmatprep.subr.bf16.mxu1 %v2720_v38  ;;  %s2868_s24 = smov [#allocation6]  }
 0x138   :  { %s2275_s25 = sshll.u32 %s2868_s24, 4  ;;  %s2276_s25 = int_to_ptr.vmem [resolvable:$true] %s2275_s25 }
 0x139   :  { %p2842_p1 = scmp.lt.s32.totalorder %s2276_s25, %s2276_s25 }
 0x13a   :  { %2512 = vmatpush3.bf16.msra.mxu1 %v2721_v39 }
 0x13b   :  { %2513 = vmatprep.subr.bf16.mxu1 %v2722_v40 }
 0x13e   :  { %2514 = vmatpush3.bf16.msra.mxu1 %v2723_v41 }
 0x13f   :  { %2515 = vmatprep.subr.bf16.mxu1 %v2724_v42 }
 0x142   :  { %2516 = vmatpush3.bf16.msra.mxu1 %v2725_v43 }
 0x143   :  { %2517 = vmatprep.subr.bf16.mxu1 %v2726_v44 }
 0x146   :  { %2518 = vmatpush3.bf16.msra.mxu1 %v2727_v45 }
 0x147   :  { %2531 = vmatprep.subr.bf16.mxu1 %v2728_v46  ;;  %v2729_v46 = vld [vmem:[%s3662_s3 + $0x80] sm:$0xff]  }
 0x177   :  { %v390_v50 = vpop.permute.xlu0 %389 }
 0x178   :  { %396 = vst.msk [vmem:[#allocation2] sm:$0xff] %vm395_vm1, %v390_v50 }
 0x17b   :  { %v392_v51 = vpop.permute.xlu0 %391 }
 0x17c   :  { %397 = vst.msk [vmem:[#allocation2 + $0x10] sm:$0xff] %vm395_vm1, %v392_v51 }
 0x17f   :  { %v401_v52 = vpop.permute.xlu0 %400 }
 0x180   :  { %407 = vst.msk [vmem:[#allocation2] sm:$0xff] %vm406_vm2, %v401_v52 }
 0x181   :  { %v403_v53 = vpop.permute.xlu1 %402 }
 0x182   :  { %408 = vst.msk [vmem:[#allocation2 + $0x10] sm:$0xff] %vm406_vm2, %v403_v53 }
 0x187   :  { %v412_v33 = vpop.permute.xlu0 %411 }
 0x188   :  { %418 = vst.msk [vmem:[#allocation2] sm:$0xff] %vm417_vm3, %v412_v33 }
 0x189   :  { %v414_v54 = vpop.permute.xlu1 %413 }
 0x18a   :  { %419 = vst.msk [vmem:[#allocation2 + $0x10] sm:$0xff] %vm417_vm3, %v414_v54 }
 0x18f   :  { %v452_v55 = vld [vmem:[#allocation2] ss:$0 sm:$0xff]  ;;  %v3068_v56 = vld [vmem:[#allocation2 + $0x2] ss:$0 sm:$0xff]  ;;  %v458_v57 = vld [vmem:[#allocation2 + $0x3] ss:$0 sm:$0xff] }
 0x190   :  { %453 = vst [vmem:[#allocation3] sm:$0x1] %v452_v55  ;;  %457 = vst [vmem:[#allocation3 + $0x10] sm:$0x1] %v3068_v56  ;;  %v3072_v58 = vld [vmem:[#allocation2 + $0x4] ss:$0 sm:$0xff] }
 0x191   :  { %459 = vst [vmem:[#allocation3 + $0x18] sm:$0x1] %v458_v57  ;;  %461 = vst [vmem:[#allocation3 + $0x1] sm:$0x1] %v3068_v56  ;;  %v466_v59 = vld [vmem:[#allocation2 + $0x5] ss:$0 sm:$0xff] }
 0x192   :  { %v3074_v60 = vld [vmem:[#allocation2 + $0x6] ss:$0 sm:$0xff]  ;;  %463 = vst [vmem:[#allocation3 + $0x9] sm:$0x1] %v458_v57  ;;  %465 = vst [vmem:[#allocation3 + $0x11] sm:$0x1] %v3072_v58 }
 0x193   :  { %467 = vst [vmem:[#allocation3 + $0x19] sm:$0x1] %v466_v59  ;;  %469 = vst [vmem:[#allocation3 + $0x2] sm:$0x1] %v3072_v58  ;;  %v3079_v61 = vld [vmem:[#allocation2 + $0x7] ss:$0 sm:$0xff] }
 0x194   :  { %473 = vst [vmem:[#allocation3 + $0x12] sm:$0x1] %v3074_v60  ;;  %v3081_v62 = vld [vmem:[#allocation2 + $0x10] ss:$0 sm:$0xff]  ;;  %v3083_v63 = vld [vmem:[#allocation2 + $0x12] ss:$0 sm:$0xff] }
 0x195   :  { %471 = vst [vmem:[#allocation3 + $0xa] sm:$0x1] %v466_v59  ;;  %475 = vst [vmem:[#allocation3 + $0x1a] sm:$0x1] %v3079_v61  ;;  %v3088_v0 = vld [vmem:[#allocation2 + $0x13] ss:$0 sm:$0xff] }
 0x196   :  { %477 = vst [vmem:[#allocation3 + $0x3] sm:$0x1] %v3081_v62  ;;  %481 = vst [vmem:[#allocation3 + $0x13] sm:$0x1] %v3083_v63  ;;  %v3091_v1 = vld [vmem:[#allocation2 + $0x14] ss:$0 sm:$0xff] }
 0x197   :  { %485 = vst [vmem:[#allocation3 + $0x4] sm:$0x1] %v3083_v63  ;;  %v3093_v2 = vld [vmem:[#allocation2 + $0x15] ss:$0 sm:$0xff]  ;;  %483 = vst [vmem:[#allocation3 + $0x1b] sm:$0x1] %v3088_v0  ;;  %v425_v7 = vpop.permute.xlu1 %424 }
 0x198   :  { %489 = vst [vmem:[#allocation3 + $0x14] sm:$0x1] %v3091_v1  ;;  %491 = vst [vmem:[#allocation3 + $0x1c] sm:$0x1] %v3093_v2  ;;  %v3099_v3 = vld [vmem:[#allocation2 + $0x16] ss:$0 sm:$0xff] }
 0x199   :  { %493 = vst [vmem:[#allocation3 + $0x5] sm:$0x1] %v3091_v1  ;;  %v3101_v4 = vld [vmem:[#allocation2 + $0x17] ss:$0 sm:$0xff]  ;;  %v512_v5 = vld [vmem:[#allocation2 + $0x1] ss:$0 sm:$0xff] }
 0x19a   :  { %487 = vst [vmem:[#allocation3 + $0xc] sm:$0x1] %v3088_v0  ;;  %495 = vst [vmem:[#allocation3 + $0xd] sm:$0x1] %v3093_v2  ;;  %516 = vrot.lane.b32.xlu0 %v512_v5, %s2862_s2  ;;  %v3108_v6 = vld [vmem:[#allocation2 + $0x11] ss:$0 sm:$0xff] }
 0x19b   :  { %497 = vst [vmem:[#allocation3 + $0x15] sm:$0x1] %v3099_v3  ;;  %499 = vst [vmem:[#allocation3 + $0x1d] sm:$0x1] %v3101_v4  ;;  %v427_v8 = vpop.permute.xlu1 %426 }
 0x19c   :  { %455 = vst [vmem:[#allocation3 + $0x8] sm:$0x1] %v512_v5  ;;  %479 = vst [vmem:[#allocation3 + $0xb] sm:$0x1] %v3108_v6 }
 0x19d   :  { %430 = vst.msk [vmem:[#allocation2 + $0x8] sm:$0xff] %vm395_vm1, %v425_v7  ;;  %431 = vst.msk [vmem:[#allocation2 + $0x18] sm:$0xff] %vm395_vm1, %v427_v8 }
 0x19e   :  { %560 = vrot.lane.b32.xlu0 %v458_v57, %s2862_s2 }
 0x19f   :  { %v435_v9 = vpop.permute.xlu0 %434 }
 0x1a0   :  { %440 = vst.msk [vmem:[#allocation2 + $0x8] sm:$0xff] %vm406_vm2, %v435_v9 }
 0x1a1   :  { %v437_v10 = vpop.permute.xlu1 %436 }
 0x1a2   :  { %604 = vrot.lane.b32.xlu0 %v466_v59, %s2862_s2  ;;  %441 = vst.msk [vmem:[#allocation2 + $0x18] sm:$0xff] %vm406_vm2, %v437_v10 }
 0x1a6   :  { %504 = vrot.lane.b32.xlu0 %v452_v55, %s2862_s2 }
 0x1a7   :  { %v445_v11 = vpop.permute.xlu0 %444 }
 0x1a8   :  { %450 = vst.msk [vmem:[#allocation2 + $0x8] sm:$0xff] %vm417_vm3, %v445_v11 }
 0x1a9   :  { %v447_v12 = vpop.permute.xlu1 %446 }
 0x1aa   :  { %549 = vrot.lane.b32.xlu0 %v3068_v56, %s2862_s2  ;;  %451 = vst.msk [vmem:[#allocation2 + $0x18] sm:$0xff] %vm417_vm3, %v447_v12 }
 0x1ae   :  { %593 = vrot.lane.b32.xlu0 %v3072_v58, %s2862_s2 }
 0x1af   :  { %v765_v13 = vld [vmem:[#allocation2 + $0x8] ss:$0 sm:$0xff]  ;;  %v3125_v14 = vld [vmem:[#allocation2 + $0xa] ss:$0 sm:$0xff]  ;;  %v771_v15 = vld [vmem:[#allocation2 + $0xb] ss:$0 sm:$0xff] }
 0x1b0   :  { %766 = vst [vmem:[#allocation3 + $0x24] sm:$0x1] %v765_v13  ;;  %770 = vst [vmem:[#allocation3 + $0x34] sm:$0x1] %v3125_v14  ;;  %v3129_v16 = vld [vmem:[#allocation2 + $0xc] ss:$0 sm:$0xff] }
 0x1b1   :  { %772 = vst [vmem:[#allocation3 + $0x3c] sm:$0x1] %v771_v15  ;;  %774 = vst [vmem:[#allocation3 + $0x25] sm:$0x1] %v3125_v14  ;;  %v779_v17 = vld [vmem:[#allocation2 + $0xd] ss:$0 sm:$0xff] }
 0x1b2   :  { %538 = vrot.lane.b32.xlu0 %v458_v57, %s2862_s2  ;;  %v3131_v18 = vld [vmem:[#allocation2 + $0xe] ss:$0 sm:$0xff]  ;;  %776 = vst [vmem:[#allocation3 + $0x2d] sm:$0x1] %v771_v15  ;;  %778 = vst [vmem:[#allocation3 + $0x35] sm:$0x1] %v3129_v16 }
 0x1b3   :  { %780 = vst [vmem:[#allocation3 + $0x3d] sm:$0x1] %v779_v17  ;;  %782 = vst [vmem:[#allocation3 + $0x26] sm:$0x1] %v3129_v16  ;;  %v787_v19 = vld [vmem:[#allocation2 + $0xf] ss:$0 sm:$0xff] }
 0x1b4   :  { %786 = vst [vmem:[#allocation3 + $0x36] sm:$0x1] %v3131_v18  ;;  %v3137_v20 = vld [vmem:[#allocation2 + $0x18] ss:$0 sm:$0xff]  ;;  %v3139_v21 = vld [vmem:[#allocation2 + $0x1a] ss:$0 sm:$0xff] }
 0x1b5   :  { %784 = vst [vmem:[#allocation3 + $0x2e] sm:$0x1] %v779_v17  ;;  %788 = vst [vmem:[#allocation3 + $0x3e] sm:$0x1] %v787_v19  ;;  %v3143_v22 = vld [vmem:[#allocation2 + $0x1b] ss:$0 sm:$0xff] }
 0x1b6   :  { %582 = vrot.lane.b32.xlu0 %v466_v59, %s2862_s2  ;;  %790 = vst [vmem:[#allocation3 + $0x27] sm:$0x1] %v3137_v20  ;;  %794 = vst [vmem:[#allocation3 + $0x37] sm:$0x1] %v3139_v21  ;;  %v3146_v23 = vld [vmem:[#allocation2 + $0x1c] ss:$0 sm:$0xff] }
 0x1b7   :  { %798 = vst [vmem:[#allocation3 + $0x40] sm:$0x1] %v3139_v21  ;;  %v3148_v24 = vld [vmem:[#allocation2 + $0x1d] ss:$0 sm:$0xff]  ;;  %796 = vst [vmem:[#allocation3 + $0x3f] sm:$0x1] %v3143_v22 }
 0x1b8   :  { %800 = vst [vmem:[#allocation3 + $0x48] sm:$0x1] %v3143_v22  ;;  %802 = vst [vmem:[#allocation3 + $0x50] sm:$0x1] %v3146_v23  ;;  %v3156_v25 = vld [vmem:[#allocation2 + $0x1e] ss:$0 sm:$0xff] }
 0x1b9   :  { %804 = vst [vmem:[#allocation3 + $0x58] sm:$0x1] %v3148_v24  ;;  %806 = vst [vmem:[#allocation3 + $0x41] sm:$0x1] %v3146_v23  ;;  %v3158_v26 = vld [vmem:[#allocation2 + $0x1f] ss:$0 sm:$0xff] }
 0x1ba   :  { %808 = vst [vmem:[#allocation3 + $0x49] sm:$0x1] %v3148_v24  ;;  %v513_v27 = vld [vmem:[#allocation2 + $0x9] ss:$0 sm:$0xff]  ;;  %810 = vst [vmem:[#allocation3 + $0x51] sm:$0x1] %v3156_v25  ;;  %626 = vrot.lane.b32.xlu0 %v3079_v61, %s2862_s2 }
 0x1bb   :  { %812 = vst [vmem:[#allocation3 + $0x59] sm:$0x1] %v3158_v26  ;;  %518 = vrot.lane.b32.xlu1 %v513_v27, %s2862_s2  ;;  %v645_v28 = vld [vmem:[#allocation2 + $0x19] ss:$0 sm:$0xff]  ;;  %768 = vst [vmem:[#allocation3 + $0x2c] sm:$0x1] %v513_v27 }
 0x1bc   :  { %792 = vst [vmem:[#allocation3 + $0x2f] sm:$0x1] %v645_v28 }
 0x1be   :  { %527 = vrot.lane.b32.xlu0 %v3068_v56, %s2862_s2 }
 0x1bf   :  { %562 = vrot.lane.b32.xlu1 %v771_v15, %s2862_s2 }
 0x1c1   :  { %v822_v42 = vld [vmem:[#allocation3 + $0x48] sm:$0x3] }
 0x1c2   :  { %648 = vrot.lane.b32.xlu0 %v3108_v6, %s2862_s2 }
 0x1c3   :  { %606 = vrot.lane.b32.xlu1 %v779_v17, %s2862_s2 }
 0x1c6   :  { %692 = vrot.lane.b32.xlu0 %v3088_v0, %s2862_s2 }
 0x1c7   :  { %506 = vrot.lane.b32.xlu1 %v765_v13, %s2862_s2 }
 0x1ca   :  { %736 = vrot.lane.b32.xlu0 %v3093_v2, %s2862_s2 }
 0x1cb   :  { %551 = vrot.lane.b32.xlu1 %v3125_v14, %s2862_s2 }
 0x1ce   :  { %637 = vrot.lane.b32.xlu0 %v3081_v62, %s2862_s2 }
 0x1cf   :  { %595 = vrot.lane.b32.xlu1 %v3129_v16, %s2862_s2 }
 0x1d2   :  { %681 = vrot.lane.b32.xlu0 %v3083_v63, %s2862_s2 }
 0x1d3   :  { %540 = vrot.lane.b32.xlu1 %v771_v15, %s2862_s2 }
 0x1d6   :  { %725 = vrot.lane.b32.xlu0 %v3091_v1, %s2862_s2 }
 0x1d7   :  { %584 = vrot.lane.b32.xlu1 %v779_v17, %s2862_s2 }
 0x1da   :  { %571 = vrot.lane.b32.xlu0 %v3072_v58, %s2862_s2 }
 0x1db   :  { %628 = vrot.lane.b32.xlu1 %v787_v19, %s2862_s2 }
 0x1de   :  { %670 = vrot.lane.b32.xlu0 %v3088_v0, %s2862_s2 }
 0x1df   :  { %529 = vrot.lane.b32.xlu1 %v3125_v14, %s2862_s2 }
 0x1e2   :  { %714 = vrot.lane.b32.xlu0 %v3093_v2, %s2862_s2 }
 0x1e3   :  { %650 = vrot.lane.b32.xlu1 %v645_v28, %s2862_s2 }
 0x1e6   :  { %758 = vrot.lane.b32.xlu0 %v3101_v4, %s2862_s2 }
 0x1e7   :  { %694 = vrot.lane.b32.xlu1 %v3143_v22, %s2862_s2 }
 0x1ea   :  { %615 = vrot.lane.b32.xlu0 %v3074_v60, %s2862_s2 }
 0x1eb   :  { %738 = vrot.lane.b32.xlu1 %v3148_v24, %s2862_s2 }
 0x1ee   :  { %659 = vrot.lane.b32.xlu0 %v3083_v63, %s2862_s2 }
 0x1ef   :  { %639 = vrot.lane.b32.xlu1 %v3137_v20, %s2862_s2 }
 0x1f2   :  { %703 = vrot.lane.b32.xlu0 %v3091_v1, %s2862_s2 }
 0x1f3   :  { %683 = vrot.lane.b32.xlu1 %v3139_v21, %s2862_s2 }
 0x1f6   :  { %747 = vrot.lane.b32.xlu0 %v3099_v3, %s2862_s2 }
 0x1f7   :  { %727 = vrot.lane.b32.xlu1 %v3146_v23, %s2862_s2 }
 0x1fb   :  { %573 = vrot.lane.b32.xlu1 %v3129_v16, %s2862_s2 }
 0x1ff   :  { %617 = vrot.lane.b32.xlu1 %v3131_v18, %s2862_s2 }
 0x203   :  { %672 = vrot.lane.b32.xlu1 %v3143_v22, %s2862_s2 }
 0x207   :  { %716 = vrot.lane.b32.xlu1 %v3148_v24, %s2862_s2 }
 0x20b   :  { %760 = vrot.lane.b32.xlu1 %v3158_v26, %s2862_s2 }
 0x20c   :  { %v517_v47 = vpop.permute.xlu0 %516 }
 0x20f   :  { %661 = vrot.lane.b32.xlu1 %v3139_v21, %s2862_s2 }
 0x210   :  { %v561_v48 = vpop.permute.xlu0 %560 }
 0x213   :  { %705 = vrot.lane.b32.xlu1 %v3146_v23, %s2862_s2 }
 0x214   :  { %v605_v49 = vpop.permute.xlu0 %604 }
 0x217   :  { %749 = vrot.lane.b32.xlu1 %v3156_v25, %s2862_s2 }
 0x218   :  { %v505_v50 = vpop.permute.xlu0 %504 }
 0x21c   :  { %v550_v51 = vpop.permute.xlu0 %549 }
 0x220   :  { %v594_v52 = vpop.permute.xlu0 %593 }
 0x224   :  { %v539_v53 = vpop.permute.xlu0 %538 }
 0x228   :  { %v583_v33 = vpop.permute.xlu0 %582 }
 0x22c   :  { %v627_v55 = vpop.permute.xlu0 %626 }
 0x22d   :  { %v519_v54 = vpop.permute.xlu1 %518 }
 0x22e   :  { %v520_v56 = vsel %vm508_vm4, %v517_v47, %v519_v54 }
 0x22f   :  { %522 = vst [vmem:[#allocation3 + $0xe] sm:$0x1] %v520_v56  ;;  %v2733_v56 = vld [vmem:[%s3662_s3 + $0x90] sm:$0xff]  }
 0x230   :  { %v528_v58 = vpop.permute.xlu0 %527 }
 0x231   :  { %v563_v57 = vpop.permute.xlu1 %562 }
 0x232   :  { %v564_v59 = vsel %vm508_vm4, %v561_v48, %v563_v57  ;;  %v2730_v48 = vld [vmem:[%s3662_s3 + $0xc8] sm:$0xff]  }
 0x233   :  { %566 = vst [vmem:[#allocation3 + $0xf] sm:$0x1] %v564_v59 }
 0x234   :  { %v649_v61 = vpop.permute.xlu0 %648 }
 0x235   :  { %v607_v60 = vpop.permute.xlu1 %606 }
 0x236   :  { %v608_v62 = vsel %vm508_vm4, %v605_v49, %v607_v60  ;;  %v830_v49 = vpack.c.bf16 %v822_v42, %v822_v42 }
 0x237   :  { %610 = vst [vmem:[#allocation3 + $0x28] sm:$0x1] %v608_v62  ;;  %v2735_v62 = vld [vmem:[%s3662_s3 + $0x98] sm:$0xff]  }
 0x238   :  { %v693_v1 = vpop.permute.xlu0 %692 }
 0x239   :  { %v507_v63 = vpop.permute.xlu1 %506 }
 0x23a   :  { %v509_v0 = vsel %vm508_vm4, %v505_v50, %v507_v63  ;;  %v814_v31 = vld [vmem:[#allocation3 + $0x8] sm:$0xff]  ;;  %v2736_v63 = vld [vmem:[%s3662_s3 + $0xe0] sm:$0xff]  }
 0x23b   :  { %511 = vst [vmem:[#allocation3 + $0x6] sm:$0x1] %v509_v0 }
 0x23c   :  { %v737_v4 = vpop.permute.xlu0 %736 }
 0x23d   :  { %v552_v2 = vpop.permute.xlu1 %551 }
 0x23e   :  { %v553_v3 = vsel %vm508_vm4, %v550_v51, %v552_v2  ;;  %v2737_v2 = vld [vmem:[%s3662_s3 + $0xa0] sm:$0xff]  }
 0x23f   :  { %555 = vst [vmem:[#allocation3 + $0x7] sm:$0x1] %v553_v3 }
 0x240   :  { %v638_v9 = vpop.permute.xlu0 %637 }
 0x241   :  { %v596_v5 = vpop.permute.xlu1 %595 }
 0x242   :  { %v597_v6 = vsel %vm508_vm4, %v594_v52, %v596_v5  ;;  %v2731_v52 = vld [vmem:[%s3662_s3 + $0x88] sm:$0xff]  }
 0x243   :  { %599 = vst [vmem:[#allocation3 + $0x20] sm:$0x1] %v597_v6 }
 0x244   :  { %v682_v12 = vpop.permute.xlu0 %681 }
 0x245   :  { %v541_v7 = vpop.permute.xlu1 %540 }
 0x246   :  { %v542_v8 = vsel %vm508_vm4, %v539_v53, %v541_v7  ;;  %v813_v44 = vld [vmem:[#allocation3] sm:$0xff]  ;;  %v2732_v53 = vld [vmem:[%s3662_s3 + $0xd0] sm:$0xff]  }
 0x247   :  { %544 = vst [vmem:[#allocation3 + $0x1e] sm:$0x1] %v542_v8 }
 0x248   :  { %v726_v17 = vpop.permute.xlu0 %725 }
 0x249   :  { %v585_v10 = vpop.permute.xlu1 %584 }
 0x24a   :  { %v586_v11 = vsel %vm508_vm4, %v583_v33, %v585_v10  ;;  %v821_v33 = vld [vmem:[#allocation3 + $0x40] sm:$0x3] }
 0x24b   :  { %588 = vst [vmem:[#allocation3 + $0x1f] sm:$0x1] %v586_v11  ;;  %v829_v57 = vpack.c.bf16 %v821_v33, %v821_v33  ;;  %v2740_v11 = vld [vmem:[%s3662_s3 + $0xf0] sm:$0xff]  }
 0x24c   :  { %v572_v20 = vpop.permute.xlu0 %571 }
 0x24d   :  { %v629_v13 = vpop.permute.xlu1 %628 }
 0x24e   :  { %v630_v14 = vsel %vm508_vm4, %v627_v55, %v629_v13 }
 0x24f   :  { %632 = vst [vmem:[#allocation3 + $0x38] sm:$0x1] %v630_v14 }
 0x250   :  { %v671_v25 = vpop.permute.xlu0 %670 }
 0x251   :  { %v530_v15 = vpop.permute.xlu1 %529 }
 0x252   :  { %v531_v16 = vsel %vm508_vm4, %v528_v58, %v530_v15  ;;  %v2734_v58 = vld [vmem:[%s3662_s3 + $0xd8] sm:$0xff]   ;;  %v2741_v15 = vld [vmem:[%s3662_s3 + $0xb0] sm:$0xff]  }
 0x253   :  { %533 = vst [vmem:[#allocation3 + $0x16] sm:$0x1] %v531_v16  ;;  %v816_v7 = vld [vmem:[#allocation3 + $0x18] sm:$0xff] }
 0x254   :  { %v715_v28 = vpop.permute.xlu0 %714  ;;  %v2742_v16 = vld [vmem:[%s3662_s3 + $0xf8] sm:$0xff]  }
 0x255   :  { %v651_v18 = vpop.permute.xlu1 %650 }
 0x256   :  { %v652_v19 = vsel %vm508_vm4, %v649_v61, %v651_v18  ;;  %v824_v18 = vld [vmem:[#allocation3 + $0x58] sm:$0x3] }
 0x257   :  { %654 = vst [vmem:[#allocation3 + $0x29] sm:$0x1] %v652_v19 }
 0x258   :  { %v759_v37 = vpop.permute.xlu0 %758 }
 0x259   :  { %v695_v21 = vpop.permute.xlu1 %694 }
 0x25a   :  { %v696_v22 = vsel %vm508_vm4, %v693_v1, %v695_v21 }
 0x25b   :  { %698 = vst [vmem:[#allocation3 + $0x2a] sm:$0x1] %v696_v22  ;;  %v832_v22 = vpack.c.bf16 %v824_v18, %v824_v18  ;;  %v2764_v18 = vld [vmem:[%s3664_s5 + $0x98] sm:$0xff]  }
 0x25c   :  { %v616_v40 = vpop.permute.xlu0 %615 }
 0x25d   :  { %v739_v23 = vpop.permute.xlu1 %738 }
 0x25e   :  { %v740_v24 = vsel %vm508_vm4, %v737_v4, %v739_v23  ;;  %v2738_v4 = vld [vmem:[%s3662_s3 + $0xe8] sm:$0xff]   ;;  %v823_v23 = vld [vmem:[#allocation3 + $0x50] sm:$0x3] }
 0x25f   :  { %742 = vst [vmem:[#allocation3 + $0x2b] sm:$0x1] %v740_v24  ;;  %v831_v24 = vpack.c.bf16 %v823_v23, %v823_v23  ;;  %v2767_v23 = vld [vmem:[%s3664_s5 + $0xa0] sm:$0xff]  }
 0x260   :  { %v660_v59 = vpop.permute.xlu0 %659 }
 0x261   :  { %v640_v26 = vpop.permute.xlu1 %639 }
 0x262   :  { %v641_v27 = vsel %vm508_vm4, %v638_v9, %v640_v26  ;;  %v2739_v9 = vld [vmem:[%s3662_s3 + $0xa8] sm:$0xff]  }
 0x263   :  { %643 = vst [vmem:[#allocation3 + $0x21] sm:$0x1] %v641_v27 }
 0x264   :  { %v704_v3 = vpop.permute.xlu0 %703 }
 0x265   :  { %v684_v29 = vpop.permute.xlu1 %683 }
 0x266   :  { %v685_v30 = vsel %vm508_vm4, %v682_v12, %v684_v29  ;;  %v818_v32 = vld [vmem:[#allocation3 + $0x28] sm:$0xff] }
 0x267   :  { %687 = vst [vmem:[#allocation3 + $0x22] sm:$0x1] %v685_v30  ;;  %v826_v34 = vpack.c.bf16 %v818_v32, %v814_v31 }
 0x268   :  { %v748_v12 = vpop.permute.xlu0 %747 }
 0x269   :  { %v728_v35 = vpop.permute.xlu1 %727  ;;  %1128 = vmatprep.mubr.bf16.mxu1 %v826_v34 }
 0x26a   :  { %v729_v36 = vsel %vm508_vm4, %v726_v17, %v728_v35  ;;  %v2743_v17 = vld [vmem:[%s3662_s3 + $0xb8] sm:$0xff]   ;;  %s2837_s3 = scalar_lea.vmem %s2276_s25, 32 }
 0x26b   :  { %731 = vst [vmem:[#allocation3 + $0x23] sm:$0x1] %v729_v36  ;;  %p2838_p0 = scmp.ne.s32.totalorder %s2276_s25, %s2837_s3  ;;  %p2843_p2 = scmp.lt.s32.totalorder %s2837_s3, %s2837_s3 }
 0x26d   :  { %v574_v38 = vpop.permute.xlu1 %573  ;;  %p2844_p3 = por %p2843_p2, %p2842_p1 }
 0x26e   :  { %v575_v39 = vsel %vm508_vm4, %v572_v20, %v574_v38 }
 0x26f   :  { %577 = vst [vmem:[#allocation3 + $0x17] sm:$0x1] %v575_v39  ;;  %p2845_p4 = pnand %p2844_p3, %p2838_p0 }
 0x271   :  { %v618_v41 = vpop.permute.xlu1 %617 }
 0x272   :  { %v619_v43 = vsel %vm508_vm4, %v616_v40, %v618_v41  ;;  %v817_v45 = vld [vmem:[#allocation3 + $0x20] sm:$0xff] }
 0x273   :  { %621 = vst [vmem:[#allocation3 + $0x30] sm:$0x1] %v619_v43  ;;  %v825_v47 = vpack.c.bf16 %v817_v45, %v813_v44 }
 0x275   :  { %v673_v50 = vpop.permute.xlu1 %672  ;;  %1129 = vmatmul.mubr.bf16.vlgmr.msra.gmra.mrb[0].mxu1 %v825_v47 }
 0x276   :  { %v674_v51 = vsel %vm508_vm4, %v671_v25, %v673_v50  ;;  %1136 = vmatprep.mubr.bf16.mxu1 %v830_v49  ;;  %2532 = vmatpush3.bf16.msra.mxu1 %v2729_v46  ;;  %v815_v19 = vld [vmem:[#allocation3 + $0x10] sm:$0xff] }
 0x277   :  { %676 = vst [vmem:[#allocation3 + $0x39] sm:$0x1] %v674_v51  ;;  %2533 = vmatprep.subr.bf16.mxu1 %v2730_v48  ;;  %v2744_v51 = vld [vmem:[%s3664_s5 + $0x40] sm:$0xff]  }
 0x278   :  { %2559 = vmatprep.subr.bf16.mxu0 %v2744_v51 }
 0x279   :  { %v717_v54 = vpop.permute.xlu1 %716 }
 0x27a   :  { %v718_v55 = vsel %vm508_vm4, %v715_v28, %v717_v54  ;;  %2534 = vmatpush3.bf16.msra.mxu1 %v2731_v52  ;;  %v2745_v52 = vld [vmem:[%s3664_s5] sm:$0xff]  }
 0x27b   :  { %720 = vst [vmem:[#allocation3 + $0x3a] sm:$0x1] %v718_v55  ;;  %2535 = vmatprep.subr.bf16.mxu1 %v2732_v53  ;;  %v2746_v53 = vld [vmem:[%s3664_s5 + $0x48] sm:$0xff]   ;;  %2560 = vmatpush3.bf16.msra.mxu0 %v2745_v52 }
 0x27c   :  { %2561 = vmatprep.subr.bf16.mxu0 %v2746_v53 }
 0x27d   :  { %v761_v60 = vpop.permute.xlu1 %760  ;;  %1137 = vmatmul.mubr.bf16.gmra.mrb[4].mxu1 %v829_v57 }
 0x27e   :  { %v762_v61 = vsel %vm508_vm4, %v759_v37, %v761_v60  ;;  %2536 = vmatpush3.bf16.msra.mxu1 %v2733_v56  ;;  %v2316_v37 = vld [vmem:[%s3663_s4] ss:$0 sm:$0xff]  ;;  %v2747_v60 = vld [vmem:[%s3664_s5 + $0x8] sm:$0xff]  }
 0x27f   :  { %764 = vst [vmem:[#allocation3 + $0x3b] sm:$0x1] %v762_v61  ;;  %2537 = vmatprep.subr.bf16.mxu1 %v2734_v58  ;;  %v2754_v61 = vld [vmem:[%s3664_s5 + $0xc0] sm:$0xff]   ;;  %2562 = vmatpush3.bf16.msra.mxu0 %v2747_v60 }
 0x281   :  { %v662_v0 = vpop.permute.xlu1 %661 }
 0x282   :  { %v663_v1 = vsel %vm508_vm4, %v660_v59, %v662_v0  ;;  %2538 = vmatpush3.bf16.msra.mxu1 %v2735_v62  ;;  %v2755_v62 = vld [vmem:[%s3664_s5 + $0x80] sm:$0xff]  }
 0x283   :  { %665 = vst [vmem:[#allocation3 + $0x31] sm:$0x1] %v663_v1  ;;  %2539 = vmatprep.subr.bf16.mxu1 %v2736_v63  ;;  %v2748_v1 = vld [vmem:[%s3664_s5 + $0x50] sm:$0xff]  }
 0x284   :  { %2563 = vmatprep.subr.bf16.mxu0 %v2748_v1  ;;  %v2780_v1 = vld [vmem:[%s3664_s5 + $0x118] sm:$0xff]  }
 0x285   :  { %v706_v5 = vpop.permute.xlu1 %705 }
 0x286   :  { %v707_v6 = vsel %vm508_vm4, %v704_v3, %v706_v5  ;;  %2540 = vmatpush3.bf16.msra.mxu1 %v2737_v2  ;;  %v820_v8 = vld [vmem:[#allocation3 + $0x38] sm:$0xff]  ;;  %v2756_v2 = vld [vmem:[%s3664_s5 + $0xc8] sm:$0xff]   ;;  %v2749_v5 = vld [vmem:[%s3664_s5 + $0x10] sm:$0xff]  }
 0x287   :  { %709 = vst [vmem:[#allocation3 + $0x32] sm:$0x1] %v707_v6  ;;  %2541 = vmatprep.subr.bf16.mxu1 %v2738_v4  ;;  %v828_v10 = vpack.c.bf16 %v820_v8, %v816_v7  ;;  %v2758_v4 = vld [vmem:[%s3664_s5 + $0x88] sm:$0xff]   ;;  %v2760_v6 = vld [vmem:[%s3664_s5 + $0xd0] sm:$0xff]   ;;  %2564 = vmatpush3.bf16.msra.mxu0 %v2749_v5 }
 0x288   :  { %v2783_v5 = vld [vmem:[%s3666_s7 + $0x4] ss:$16 sps:$4 sm:$0xff]  }
 0x289   :  { %v750_v13 = vpop.permute.xlu1 %749  ;;  %1176 = vmatprep.mubr.bf16.mxu1 %v828_v10 }
 0x28a   :  { %v751_v14 = vsel %vm508_vm4, %v748_v12, %v750_v13  ;;  %2542 = vmatpush3.bf16.msra.mxu1 %v2739_v9  ;;  %v2750_v9 = vld [vmem:[%s3664_s5 + $0x58] sm:$0xff]   ;;  %v2752_v13 = vld [vmem:[%s3664_s5 + $0x60] sm:$0xff]  }
 0x28b   :  { %753 = vst [vmem:[#allocation3 + $0x33] sm:$0x1] %v751_v14  ;;  %2543 = vmatprep.subr.bf16.mxu1 %v2740_v11  ;;  %v2761_v11 = vld [vmem:[%s3664_s5 + $0x90] sm:$0xff]   ;;  %v2751_v12 = vld [vmem:[%s3664_s5 + $0x18] sm:$0xff]   ;;  %2565 = vmatprep.subr.bf16.mxu0 %v2750_v9  ;;  %v2753_v14 = vld [vmem:[%s3664_s5 + $0x20] sm:$0xff]  }
 0x28c   :  { %2566 = vmatpush3.bf16.msra.mxu0 %v2751_v12  ;;  %v2792_v9 = vld [vmem:[%s3666_s7 + $0x2c] ss:$16 sps:$4 sm:$0xff]   ;;  %v2795_v12 = vld [vmem:[%s3666_s7 + $0x44] ss:$16 sps:$4 sm:$0xff]  }
 0x28d   :  { %2567 = vmatprep.subr.bf16.mxu0 %v2752_v13  ;;  %v2798_v13 = vld [vmem:[%s3666_s7 + $0x4c] ss:$16 sps:$4 sm:$0xff]  }
 0x28e   :  { %2544 = vmatpush3.bf16.msra.mxu1 %v2741_v15  ;;  %v2757_v15 = vld [vmem:[%s3664_s5 + $0x68] sm:$0xff]  }
 0x28f   :  { %2545 = vmatprep.subr.bf16.mxu1 %v2742_v16  ;;  %v2759_v16 = vld [vmem:[%s3664_s5 + $0x28] sm:$0xff]  }
 0x290   :  { %2568 = vmatpush3.bf16.msra.mxu0 %v2753_v14  ;;  %v2793_v14 = vld [vmem:[%s3666_s7 + $0x40] ss:$16 sps:$4 sm:$0xff]  }
 0x291   :  { %2569 = vmatprep.subr.bf16.mxu0 %v2757_v15  ;;  %v2796_v15 = vld [vmem:[%s3666_s7 + $0x48] ss:$16 sps:$4 sm:$0xff]  }
 0x292   :  { %2546 = vmatpush3.bf16.msra.mxu1 %v2743_v17  ;;  %v819_v20 = vld [vmem:[#allocation3 + $0x30] sm:$0xff]  ;;  %v2762_v17 = vld [vmem:[%s3664_s5 + $0xd8] sm:$0xff]  }
 0x293   :  { %v827_v21 = vpack.c.bf16 %v819_v20, %v815_v19  ;;  %2581 = vmatprep.subr.bf16.mxu1 %v2754_v61  ;;  %v2763_v19 = vld [vmem:[%s3664_s5 + $0x70] sm:$0xff]  }
 0x294   :  { %2570 = vmatpush3.bf16.msra.mxu0 %v2759_v16  ;;  %v2765_v20 = vld [vmem:[%s3664_s5 + $0x30] sm:$0xff]  }
 0x295   :  { %1177 = vmatmul.mubr.bf16.vlgmr.msra.gmra.mrb[8].mxu1 %v827_v21  ;;  %v2766_v21 = vld [vmem:[%s3664_s5 + $0xe0] sm:$0xff]   ;;  %2571 = vmatprep.subr.bf16.mxu0 %v2763_v19  ;;  %v2802_v19 = vld [vmem:[%s3666_s7 + $0x68] ss:$16 sps:$4 sm:$0xff]  }
 0x296   :  { %1184 = vmatprep.mubr.bf16.mxu1 %v832_v22  ;;  %2582 = vmatpush3.bf16.msra.mxu1 %v2755_v62  ;;  %v2801_v16 = vld [vmem:[%s3666_s7 + $0x64] ss:$16 sps:$4 sm:$0xff]  }
 0x297   :  { %2583 = vmatprep.subr.bf16.mxu1 %v2756_v2 }
 0x298   :  { %2572 = vmatpush3.bf16.msra.mxu0 %v2765_v20  ;;  %v2867_v20 = vmov 0  }
 0x29a   :  { %2584 = vmatpush3.bf16.msra.mxu1 %v2758_v4  ;;  %v2781_v4 = vld [vmem:[%s3666_s7] ss:$16 sps:$4 sm:$0xff]  }
 0x29b   :  { %2585 = vmatprep.subr.bf16.mxu1 %v2760_v6  ;;  %v2784_v6 = vld [vmem:[%s3666_s7 + $0x8] ss:$16 sps:$4 sm:$0xff]  }
 0x29d   :  { %1185 = vmatmul.mubr.bf16.gmra.mrb[12].mxu1 %v831_v24  ;;  %v2768_v24 = vld [vmem:[%s3664_s5 + $0xe8] sm:$0xff]  }
 0x29e   :  { %2586 = vmatpush3.bf16.msra.mxu1 %v2761_v11  ;;  %v2790_v11 = vld [vmem:[%s3666_s7 + $0x28] ss:$16 sps:$4 sm:$0xff]  }
 0x29f   :  { %2587 = vmatprep.subr.bf16.mxu1 %v2762_v17  ;;  %v2804_v17 = vld [vmem:[%s3666_s7 + $0x6c] ss:$16 sps:$4 sm:$0xff]  }
 0x2a2   :  { %2588 = vmatpush3.bf16.msra.mxu1 %v2764_v18  ;;  %v2799_v18 = vld [vmem:[%s3666_s7 + $0x60] ss:$16 sps:$4 sm:$0xff]  }
 0x2a3   :  { %2589 = vmatprep.subr.bf16.mxu1 %v2766_v21  ;;  %v2805_v21 = vld [vmem:[%s3668_s9 + $0x40] sm:$0xff]  }
 0x2a6   :  { %2590 = vmatpush3.bf16.msra.mxu1 %v2767_v23 }
 0x2a7   :  { %2591 = vmatprep.subr.bf16.mxu1 %v2768_v24  ;;  %v2350_v24 = vld [vmem:[%s3665_s6] ss:$0 sm:$0xff] }
 0x348   :  { %v2519_v25 = vpop.f32.mrb[0].mxu1 }
 0x349   :  { %v2520_v26 = vpop.f32.mrb[1].mxu1 }
 0x34a   :  { %v2521_v27 = vadd.f32 %v2520_v26, %v2519_v25  ;;  %v2522_v28 = vpop.f32.mrb[2].mxu1  ;;  %v2769_v25 = vld [vmem:[%s3664_s5 + $0x78] sm:$0xff]  }
 0x34b   :  { %v2523_v29 = vpop.f32.mrb[3].mxu1  ;;  %v2771_v26 = vld [vmem:[%s3664_s5 + $0x38] sm:$0xff]   ;;  %2573 = vmatprep.subr.bf16.mxu0 %v2769_v25 }
 0x34c   :  { %v2524_v30 = vadd.f32 %v2523_v29, %v2522_v28  ;;  %v1131_v40 = vadd.f32 %v2521_v27, %v2316_v37  ;;  %v1216_v27 = vlaneseq  ;;  %v2770_v28 = vld [vmem:[%s3664_s5 + $0xa8] sm:$0xff]   ;;  %v2772_v29 = vld [vmem:[%s3664_s5 + $0xf0] sm:$0xff]   ;;  %2574 = vmatpush3.bf16.msra.mxu0 %v2771_v26 }
 0x34d   :  { %2592 = vmatpush3.bf16.msra.mxu1 %v2770_v28 }
 0x34e   :  { %v1134_v44 = vadd.f32 %v2524_v30, %v2316_v37  ;;  %vm3447_vm9 = vcmp.lt.s32.totalorder %v1216_v27, 192  ;;  %2593 = vmatprep.subr.bf16.mxu1 %v2772_v29  ;;  %vm1229_vm10 = vcmp.ge.s32.totalorder %v1216_v27, 64  ;;  %vm1230_vm11 = vcmp.lt.s32.totalorder %v1216_v27, 256 }
 0x34f   :  { %vm1231_vm12 = vmand %vm1229_vm10, %vm1230_vm11  ;;  %v3472_v51 = vshrl.u32 %v1216_v27, 7 }
 0x350   :  { %v2525_v31 = vpop.f32.mrb[4].mxu1 }
 0x351   :  { %v2526_v32 = vpop.f32.mrb[5].mxu1 }
 0x352   :  { %v2527_v34 = vadd.f32 %v2526_v32, %v2525_v31  ;;  %v2528_v35 = vpop.f32.mrb[6].mxu1  ;;  %v2773_v31 = vld [vmem:[%s3664_s5 + $0xb0] sm:$0xff]   ;;  %v2774_v32 = vld [vmem:[%s3664_s5 + $0xf8] sm:$0xff]  }
 0x353   :  { %v2529_v36 = vpop.f32.mrb[7].mxu1  ;;  %2594 = vmatpush3.bf16.msra.mxu1 %v2773_v31 }
 0x354   :  { %v1139_v54 = vadd.f32 %v2527_v34, %v2316_v37  ;;  %2595 = vmatprep.subr.bf16.mxu1 %v2774_v32 }
 0x368   :  { %v2547_v38 = vpop.f32.mrb[8].mxu1 }
 0x369   :  { %v2548_v39 = vpop.f32.mrb[9].mxu1 }
 0x36a   :  { %v2549_v41 = vadd.f32 %v2548_v39, %v2547_v38  ;;  %v2550_v42 = vpop.f32.mrb[10].mxu1 }
 0x36b   :  { %v2551_v43 = vpop.f32.mrb[11].mxu1 }
 0x36c   :  { %v1179_v45 = vadd.f32 %v2549_v41, %v1131_v40  ;;  %v2552_v46 = vadd.f32 %v2551_v43, %v2550_v42  ;;  %v2775_v40 = vld [vmem:[%s3664_s5 + $0xb8] sm:$0xff]   ;;  %v2864_v41 = vmov 0.0  }
 0x36d   :  { %2652 = vmatprep.subr.bf16.mxu0 %v2864_v41  ;;  %2596 = vmatpush3.bf16.msra.mxu1 %v2775_v40 }
 0x36e   :  { %v1192_v47 = vmax.f32 %v1179_v45, 0.0  ;;  %v1182_v48 = vadd.f32 %v2552_v46, %v1134_v44  ;;  %v2865_v44 = vmov 1983009808   ;;  %1835 = vmatprep.subr.bf16.mxu1 %v2783_v5  ;;  %v2832_v5 = vld [vmem:[%s3668_s9 + $0xb0] sm:$0xff]  }
 0x36f   :  { %v1262_v45 = vunpack.c.l.s4 %v2865_v44  ;;  %v2808_v44 = vld [vmem:[%s3668_s9 + $0x80] sm:$0xff]  }
 0x370   :  { %v1193_v49 = vmax.f32 %v1182_v48, 0.0  ;;  %v2553_v50 = vpop.f32.mrb[12].mxu1  ;;  %1196 = vst.msk [vmem:[#allocation4] sm:$0x3f] %vm1195_vm5, %v1192_v47  ;;  %v1200_v55 = vrot.slane %v1192_v47, 6 }
 0x371   :  { %v2554_v33 = vpop.f32.mrb[13].mxu1 }
 0x372   :  { %v1201_v56 = vrot.slane %v1193_v49, 6  ;;  %v2555_v57 = vadd.f32 %v2554_v33, %v2553_v50  ;;  %v2556_v58 = vpop.f32.mrb[14].mxu1  ;;  %v1210_v7 = vrot.slane %v1193_v49, 4  ;;  %v1263_v50 = vunpack.c.0.s8 %v1262_v45 }
 0x373   :  { %v2557_v59 = vpop.f32.mrb[15].mxu1  ;;  %v2776_v58 = vld [vmem:[%s3664_s5 + $0x100] sm:$0xff]  }
 0x374   :  { %v1187_v63 = vadd.f32 %v2555_v57, %v1139_v54  ;;  %v1202_v0 = vsel %vm1199_vm6, %v1200_v55, %v1201_v56  ;;  %v1266_v52 = vsub.s32 %v1263_v50, %v3472_v51  ;;  %v2813_v50 = vld [vmem:[%s3668_s9 + $0x50] sm:$0xff]  }
 0x375   :  { %1203 = vrot.lane.b32.xlu0 %v1202_v0, %s2862_s2  ;;  %v2779_v0 = vld [vmem:[%s3664_s5 + $0x110] sm:$0xff]  }
 0x376   :  { %v1194_v3 = vmax.f32 %v1187_v63, 0.0  ;;  %v2778_v63 = vld [vmem:[%s3664_s5 + $0x108] sm:$0xff]  }
 0x378   :  { %v1211_v8 = vrot.slane %v1194_v3, 4 }
 0x37a   :  { %v1212_v10 = vsel %vm1209_vm7, %v1210_v7, %v1211_v8  ;;  %v2786_v7 = vld [vmem:[%s3666_s7 + $0xc] ss:$16 sps:$4 sm:$0xff]   ;;  %v2789_v8 = vld [vmem:[%s3666_s7 + $0x24] ss:$16 sps:$4 sm:$0xff]  }
 0x37b   :  { %1214 = vst.msk [vmem:[#allocation4 + $0x8] sm:$0x3f] %vm1195_vm5, %v1212_v10  ;;  %v2787_v10 = vld [vmem:[%s3666_s7 + $0x20] ss:$16 sps:$4 sm:$0xff]  }
 0x3e7   :  { %v1204_v22 = vpop.permute.xlu0 %1203 }
 0x3e8   :  { %1207 = vst.msk [vmem:[#allocation4] sm:$0x3f] %vm1206_vm8, %v1204_v22  ;;  %v2806_v22 = vld [vmem:[%s3668_s9 + $0xc0] sm:$0xff]  }
 0x3ef   :  { %v1243_v34 = vld [vmem:[#allocation4 + $0x4] ss:$8 sm:$0x3]  ;;  %v1222_v35 = vld [vmem:[#allocation4 + $0x1] ss:$8 sm:$0x3] }
 0x3f0   :  { %1245 = vrot.lane.b32.xlu0 %v1243_v34, %s2862_s2  ;;  %1224 = vrot.lane.b32.xlu1 %v1222_v35, %s2862_s2  ;;  %v1253_v36 = vld [vmem:[#allocation4 + $0x5] ss:$8 sm:$0x3]  ;;  %v1235_v37 = vld [vmem:[#allocation4 + $0x2] ss:$8 sm:$0x3] }
 0x3f1   :  { %1255 = vst.msk [vmem:[#allocation5 + $0x7] ss:$2 sm:$0x3] %vm3447_vm9, %v1253_v36  ;;  %1237 = vst.msk [vmem:[#allocation5 + $0x6] ss:$2 sm:$0x3] %vm3447_vm9, %v1235_v37 }
 0x3f2   :  { %v1239_v38 = vld [vmem:[#allocation4 + $0x3] ss:$8 sm:$0x3]  ;;  %v1215_v39 = vld [vmem:[#allocation4] ss:$8 sm:$0x3] }
 0x3f3   :  { %1241 = vst.msk [vmem:[#allocation5 + $0x1] ss:$2 sm:$0x3] %vm3447_vm9, %v1239_v38  ;;  %1220 = vst.msk [vmem:[#allocation5] ss:$2 sm:$0x3] %vm3447_vm9, %v1215_v39 }
 0x3f8   :  { %v2349_v2 = vld.sshfl [vmem:[#allocation5 + $0x8] sm:$0x3 pattern:$0x76325410] }
 0x3f9   :  { %v1293_v3 = vpack.c.bf16 %v2349_v2, %v2349_v2  ;;  %v2829_v2 = vld [vmem:[%s3668_s9 + $0x70] sm:$0xff]  }
 0x462   :  { %v1246_v42 = vpop.permute.xlu0 %1245  ;;  %v1225_v43 = vpop.permute.xlu1 %1224 }
 0x463   :  { %v1247_v46 = vrot.slane %v1246_v42, 7  ;;  %v1226_v47 = vrot.slane %v1225_v43, 7 }
 0x465   :  { %v1248_v48 = vsel %vm508_vm4, %v1247_v46, %v1246_v42  ;;  %v1227_v49 = vsel %vm508_vm4, %v1226_v47, %v1225_v43  ;;  %v2807_v43 = vld [vmem:[%s3668_s9] sm:$0xff]   ;;  %v2809_v46 = vld [vmem:[%s3668_s9 + $0x48] sm:$0xff]  }
 0x466   :  { %1251 = vst.msk [vmem:[#allocation5 + $0x3] ss:$2 sm:$0x3] %vm1231_vm12, %v1248_v48  ;;  %1233 = vst.msk [vmem:[#allocation5 + $0x2] ss:$2 sm:$0x3] %vm1231_vm12, %v1227_v49 }
 0x467   :  { %v2810_v47 = vld [vmem:[%s3668_s9 + $0xc8] sm:$0xff]  }
 0x468   :  { %v2811_v48 = vld [vmem:[%s3668_s9 + $0x8] sm:$0xff]  }
 0x469   :  { %v2812_v49 = vld [vmem:[%s3668_s9 + $0x88] sm:$0xff]  }
 0x46d   :  { %v1256_v53 = vld [vmem:[#allocation5] sm:$0xff] }
 0x46e   :  { %v1267_v33 = vrot.slane %v1256_v53, %v1266_v52  ;;  %v1260_v54 = vcombine.high %v1256_v53, %v1256_v53  ;;  %v2815_v53 = vld [vmem:[%s3668_s9 + $0x10] sm:$0xff]  }
 0x470   :  { %v1275_v55 = vcombine.high %v1267_v33, %v1267_v33  ;;  %v1274_v56 = vrot.slane %v1260_v54, %v1266_v52  ;;  %v1289_v60 = vpack.c.bf16 %v1267_v33, %v1267_v33  ;;  %v2814_v52 = vld [vmem:[%s3668_s9 + $0xd0] sm:$0xff]   ;;  %v2817_v54 = vld [vmem:[%s3668_s9 + $0x58] sm:$0xff]  }
 0x471   :  { %v2816_v33 = vld [vmem:[%s3668_s9 + $0x90] sm:$0xff]  }
 0x472   :  { %v1290_v57 = vpack.c.bf16 %v1275_v55, %v1275_v55  ;;  %v1276_v59 = vcombine.high %v1274_v56, %v1274_v56  ;;  %v1291_v62 = vpack.c.bf16 %v1274_v56, %v1274_v56  ;;  %v2818_v55 = vld [vmem:[%s3668_s9 + $0xd8] sm:$0xff]  }
 0x473   :  { %v2819_v56 = vld [vmem:[%s3668_s9 + $0x18] sm:$0xff]  }
 0x474   :  { %1624 = vmatprep.mubr.bf16.mxu0 %v1290_v57  ;;  %v1292_v61 = vpack.c.bf16 %v1276_v59, %v1276_v59  ;;  %v2820_v57 = vld [vmem:[%s3668_s9 + $0x98] sm:$0xff]   ;;  %v2822_v59 = vld [vmem:[%s3668_s9 + $0xe0] sm:$0xff]  }
 0x475   :  { %1625 = vmatmul.mubr.bf16.vlgmr.msra.gmra.mrb[32].mxu0 %v1289_v60  ;;  %v2823_v60 = vld [vmem:[%s3668_s9 + $0x20] sm:$0xff]  }
 0x476   :  { %2653 = vmatpush3.bf16.msra.mxu0 %v2776_v58  ;;  %1664 = vmatprep.mubr.bf16.mxu1 %v1292_v61  ;;  %v2821_v58 = vld [vmem:[%s3668_s9 + $0x60] sm:$0xff]  }
 0x477   :  { %1665 = vmatmul.mubr.bf16.vlgmr.msra.gmra.mrb[16].mxu1 %v1291_v62  ;;  %2654 = vmatprep.subr.bf16.mxu0 %v2864_v41  ;;  %v2824_v61 = vld [vmem:[%s3668_s9 + $0xa0] sm:$0xff]   ;;  %v2825_v62 = vld [vmem:[%s3668_s9 + $0x68] sm:$0xff]  }
 0x478   :  { %2660 = vmatprep.mubr.msk.bf16.mxu0 %vm2866_vm13, %v2864_v41  ;;  %1836 = vmatpush1.bf16.msra.mxu1 %v2781_v4  ;;  %v2831_v4 = vld [vmem:[%s3668_s9 + $0x30] sm:$0xff]  }
 0x479   :  { %1837 = vmatprep.subr.bf16.mxu1 %v2789_v8  ;;  %1867 = vmatprep.mubr.bf16.mxu1 %v2867_v20  ;;  %v2835_v8 = vld [vmem:[%s3668_s9 + $0x38] sm:$0xff]  }
 0x47a   :  { %2655 = vmatpush3.bf16.msra.mxu0 %v2778_v63  ;;  %v2826_v63 = vld [vmem:[%s3668_s9 + $0xe8] sm:$0xff]  }
 0x47b   :  { %2656 = vmatprep.subr.bf16.mxu0 %v2864_v41 }
 0x47c   :  { %1838 = vmatpush1.bf16.msra.mxu1 %v2787_v10  ;;  %v1734_v10 = vsub.s32 0, %v3472_v51 }
 0x47d   :  { %1839 = vmatprep.subr.bf16.mxu1 %v2795_v12  ;;  %v1730_v12 = vld [vmem:[%s3667_s8] sm:$0xf] }
 0x47e   :  { %2657 = vmatpush3.bf16.msra.mxu0 %v2779_v0  ;;  %v2827_v0 = vld [vmem:[%s3668_s9 + $0x28] sm:$0xff]  }
 0x47f   :  { %2658 = vmatprep.subr.bf16.mxu0 %v2864_v41 }
 0x480   :  { %1840 = vmatpush1.bf16.msra.mxu1 %v2793_v14  ;;  %v1746_v14 = vsub.s32 3, %v3472_v51 }
 0x481   :  { %1841 = vmatprep.subr.bf16.mxu1 %v2801_v16 }
 0x482   :  { %2659 = vmatpush3.bf16.msra.mxu0 %v2780_v1  ;;  %v2828_v1 = vld [vmem:[%s3668_s9 + $0xa8] sm:$0xff]  }
 0x483   :  { %1876 = vmatprep.subr.bf16.mxu0 %v2786_v7  ;;  %v2834_v7 = vld [vmem:[%s3668_s9 + $0xf8] sm:$0xff]  }
 0x484   :  { %1842 = vmatpush1.bf16.msra.mxu1 %v2799_v18  ;;  %v1747_v18 = vrot.slane %v1730_v12, %v1746_v14 }
 0x485   :  { %2661 = vmatmul.mubr.msk.bf16.vlgmr.msra.gmra.mrb[36].mxu0 %vm508_vm4, %v1293_v3  ;;  %2608 = vmatprep.subr.bf16.mxu1 %v2805_v21  ;;  %v2830_v3 = vld [vmem:[%s3668_s9 + $0xf0] sm:$0xff]  }
 0x486   :  { %1877 = vmatpush1.bf16.msra.mxu0 %v2784_v6  ;;  %1908 = vmatprep.mubr.bf16.mxu0 %v2867_v20  ;;  %v2833_v6 = vld [vmem:[%s3668_s9 + $0x78] sm:$0xff]  }
 0x487   :  { %1878 = vmatprep.subr.bf16.mxu0 %v2792_v9  ;;  %v2836_v9 = vld [vmem:[%s3668_s9 + $0xb8] sm:$0xff]  }
 0x48a   :  { %1879 = vmatpush1.bf16.msra.mxu0 %v2790_v11  ;;  %v1742_v11 = vsub.s32 2, %v3472_v51 }
 0x48b   :  { %1880 = vmatprep.subr.bf16.mxu0 %v2798_v13  ;;  %v1738_v13 = vsub.s32 1, %v3472_v51 }
 0x48c   :  { %v1743_v16 = vrot.slane %v1730_v12, %v1742_v11 }
 0x48e   :  { %1881 = vmatpush1.bf16.msra.mxu0 %v2796_v15  ;;  %v1735_v15 = vrot.slane %v1730_v12, %v1734_v10 }
 0x48f   :  { %1882 = vmatprep.subr.bf16.mxu0 %v2804_v17  ;;  %v1739_v17 = vrot.slane %v1730_v12, %v1738_v13 }
 0x492   :  { %1883 = vmatpush1.bf16.msra.mxu0 %v2802_v19 }
 0x493   :  { %2630 = vmatprep.subr.bf16.mxu0 %v2806_v22 }
 0x548   :  { %v2575_v23 = vpop.f32.mrb[32].mxu0 }
 0x549   :  { %v2576_v25 = vpop.f32.mrb[33].mxu0 }
 0x54a   :  { %v2577_v26 = vadd.f32 %v2576_v25, %v2575_v23  ;;  %v2578_v27 = vpop.f32.mrb[34].mxu0  ;;  %v2597_v28 = vpop.f32.mrb[16].mxu1 }
 0x54b   :  { %v2579_v29 = vpop.f32.mrb[35].mxu0  ;;  %v2598_v30 = vpop.f32.mrb[17].mxu1 }
 0x54c   :  { %v1627_v31 = vadd.f32 %v2577_v26, %v2350_v24  ;;  %v2599_v32 = vadd.f32 %v2598_v30, %v2597_v28  ;;  %v2600_v34 = vpop.f32.mrb[18].mxu1 }
 0x54d   :  { %v2601_v35 = vpop.f32.mrb[19].mxu1 }
 0x54e   :  { %v1667_v36 = vadd.f32 %v2599_v32, %v1627_v31 }
 0x558   :  { %v1706_v37 = vpop.f32.mrb[36].mxu0 }
 0x559   :  { %v1707_v38 = vadd.f32 %v1706_v37, %v1667_v36  ;;  %v2662_v39 = vpop.f32.mrb[37].mxu0 }
 0x55a   :  { %v1709_v40 = vpop.f32.mrb[38].mxu0 }
 0x55b   :  { %v1712_v41 = vmax.f32 %v1707_v38, 0.0  ;;  %v2663_v42 = vpop.f32.mrb[39].mxu0 }
 0x55d   :  { %v1713_v45 = vpack.c.bf16 %v1712_v41, %v1712_v41  ;;  %v2406_v41 = vld [vmem:[%s3669_s10] ss:$0 sm:$0xff] }
 0x55f   :  { %2404 = vmatmul.mubr.msk.bf16.vlgmr.msra.gmra.mrb[20].mxu1 %vm508_vm4, %v1713_v45  ;;  %2405 = vmatmul.mubr.msk.bf16.vlgmr.msra.gmra.mrb[40].mxu0 %vm508_vm4, %v1713_v45 }
 0x560   :  { %2609 = vmatpush3.bf16.msra.mxu1 %v2807_v43  ;;  %2631 = vmatpush3.bf16.msra.mxu0 %v2808_v44 }
 0x561   :  { %2610 = vmatprep.subr.bf16.mxu1 %v2809_v46  ;;  %2632 = vmatprep.subr.bf16.mxu0 %v2810_v47 }
 0x564   :  { %2611 = vmatpush3.bf16.msra.mxu1 %v2811_v48  ;;  %2633 = vmatpush3.bf16.msra.mxu0 %v2812_v49 }
 0x565   :  { %2612 = vmatprep.subr.bf16.mxu1 %v2813_v50  ;;  %2634 = vmatprep.subr.bf16.mxu0 %v2814_v52 }
 0x568   :  { %2613 = vmatpush3.bf16.msra.mxu1 %v2815_v53  ;;  %2635 = vmatpush3.bf16.msra.mxu0 %v2816_v33 }
 0x569   :  { %2614 = vmatprep.subr.bf16.mxu1 %v2817_v54  ;;  %2636 = vmatprep.subr.bf16.mxu0 %v2818_v55 }
 0x56c   :  { %2615 = vmatpush3.bf16.msra.mxu1 %v2819_v56  ;;  %2637 = vmatpush3.bf16.msra.mxu0 %v2820_v57 }
 0x56d   :  { %2616 = vmatprep.subr.bf16.mxu1 %v2821_v58  ;;  %2638 = vmatprep.subr.bf16.mxu0 %v2822_v59 }
 0x570   :  { %2617 = vmatpush3.bf16.msra.mxu1 %v2823_v60  ;;  %2639 = vmatpush3.bf16.msra.mxu0 %v2824_v61 }
 0x571   :  { %2618 = vmatprep.subr.bf16.mxu1 %v2825_v62  ;;  %2640 = vmatprep.subr.bf16.mxu0 %v2826_v63 }
 0x574   :  { %2619 = vmatpush3.bf16.msra.mxu1 %v2827_v0  ;;  %2641 = vmatpush3.bf16.msra.mxu0 %v2828_v1 }
 0x575   :  { %2620 = vmatprep.subr.bf16.mxu1 %v2829_v2  ;;  %2642 = vmatprep.subr.bf16.mxu0 %v2830_v3 }
 0x578   :  { %2621 = vmatpush3.bf16.msra.mxu1 %v2831_v4  ;;  %2643 = vmatpush3.bf16.msra.mxu0 %v2832_v5 }
 0x579   :  { %2622 = vmatprep.subr.bf16.mxu1 %v2833_v6  ;;  %2644 = vmatprep.subr.bf16.mxu0 %v2834_v7 }
 0x57c   :  { %2623 = vmatpush3.bf16.msra.mxu1 %v2835_v8  ;;  %2645 = vmatpush3.bf16.msra.mxu0 %v2836_v9 }
 0x632   :  { %v1869_v19 = vpop.f32.mrb[20].mxu1  ;;  %v1910_v20 = vpop.f32.mrb[40].mxu0 }
 0x633   :  { %v1870_v21 = vadd.f32 %v1869_v19, %v1735_v15  ;;  %v1911_v22 = vadd.f32 %v1910_v20, %v1743_v16  ;;  %v1871_v23 = vpop.f32.mrb[21].mxu1  ;;  %v1912_v24 = vpop.f32.mrb[41].mxu0 }
 0x634   :  { %v1872_v25 = vadd.f32 %v1871_v23, %v1739_v17  ;;  %v1913_v26 = vadd.f32 %v1912_v24, %v1747_v18  ;;  %v1873_v27 = vpop.f32.mrb[22].mxu1  ;;  %v1914_v28 = vpop.f32.mrb[42].mxu0 }
 0x635   :  { %v1917_v29 = vmax.f32 %v1870_v21, 0.0  ;;  %v1919_v30 = vmax.f32 %v1911_v22, 0.0  ;;  %v1874_v31 = vpop.f32.mrb[23].mxu1  ;;  %v1915_v32 = vpop.f32.mrb[43].mxu0 }
 0x636   :  { %v1918_v34 = vmax.f32 %v1872_v25, 0.0  ;;  %v1920_v51 = vmax.f32 %v1913_v26, 0.0 }
 0x637   :  { %v1921_v37 = vpack.c.bf16 %v1917_v29, %v1917_v29  ;;  %v1923_v38 = vpack.c.bf16 %v1919_v30, %v1919_v30 }
 0x638   :  { %v1922_v35 = vpack.c.bf16 %v1918_v34, %v1918_v34  ;;  %v1924_v36 = vpack.c.bf16 %v1920_v51, %v1920_v51 }
 0x63a   :  { %2220 = vmatprep.mubr.bf16.mxu1 %v1922_v35  ;;  %2260 = vmatprep.mubr.bf16.mxu0 %v1924_v36 }
 0x63b   :  { %2221 = vmatmul.mubr.bf16.vlgmr.msra.gmra.mrb[24].mxu1 %v1921_v37  ;;  %2261 = vmatmul.mubr.bf16.vlgmr.msra.gmra.mrb[44].mxu0 %v1923_v38 }
 0x70e   :  { %v2624_v39 = vpop.f32.mrb[24].mxu1  ;;  %v2646_v40 = vpop.f32.mrb[44].mxu0 }
 0x70f   :  { %v2625_v42 = vpop.f32.mrb[25].mxu1  ;;  %v2647_v43 = vpop.f32.mrb[45].mxu0 }
 0x710   :  { %v2626_v44 = vadd.f32 %v2625_v42, %v2624_v39  ;;  %v2648_v45 = vadd.f32 %v2647_v43, %v2646_v40  ;;  %v2627_v46 = vpop.f32.mrb[26].mxu1  ;;  %v2649_v47 = vpop.f32.mrb[46].mxu0 }
 0x711   :  { %v2628_v48 = vpop.f32.mrb[27].mxu1  ;;  %v2650_v49 = vpop.f32.mrb[47].mxu0 }
 0x712   :  { %v2223_v50 = vadd.f32 %v2626_v44, %v2406_v41 }
 0x714   :  { %v2263_v52 = vadd.f32 %v2648_v45, %v2223_v50 }
 0x716   :  { %2268 = vst [vmem:[#allocation6] sm:$0x3] %v2263_v52 }
 0x717   :  { %2848 = shalt.err (!%p2845_p4)
}
 0x718   :  { %s2849_s27 = scalar_lea.hbm %s3670_s11, 32 }
 0x719   :  { %p2850_p5 = scmp.ne.s32.totalorder %s3670_s11, %s2849_s27  ;;  %p2853_p6 = scmp.lt.u32.totalorder %s2849_s27, %s3670_s11 }
 0x71b   :  { %p2855_p7 = pnand %p2853_p6, %p2850_p5 }
 0x71d   :  { %2858 = shalt.err (!%p2855_p7)
}
 0x71e   :  { %2278 = dma.vmem_to_hbm [thread:$0]  %s2276_s25, 32, %s3670_s11, [#allocation7]  }
 0x71f   :  { %2859 = dma.done.wait [#allocation7], 32  }
 0x720   :  { %2860 = vsyncadd [#allocation7], 4294967264 }
 0x721   :  { %2282 = vsyncpa [#allocation7], 1 }

</bundles_post_ra>
